<compile_context>
chip_gen: v7x
topology: tpu7x:2x2x1
jax: 0.10.0
libtpu: 0.0.40
codegen_flags: <defaults>
</compile_context>

<pallas_src>
import functools

import jax
import jax.numpy as jnp
from jax.experimental import pallas as pl
from jax.experimental.pallas import tpu as pltpu


def _xcorr_kernel(z_ref, x_ref, o_ref, *, hz, wz, wx_pad, wo, tile_h,
                  lane_chunk, n_chunks):
    """One (channel-block, output-row-band) grid step.

    z_ref: (hz*wz, wx_pad, bcb)  template taps, sublane-pre-broadcast (VMEM)
    x_ref: (hx_pad, wx_pad, bcb) search features, resident across bands (VMEM)
    o_ref: (tile_h, wo, bcb)     one output row band (VMEM)
    """
    h0 = pl.program_id(1) * tile_h

    def do_chunk(c0):
        lanes = pl.ds(c0, lane_chunk)
        acc = jnp.zeros((tile_h, wx_pad, lane_chunk), jnp.float32)
        for u in range(hz):
            # Major-dim (H) slice of the resident search block: whole
            # (wx_pad, lanes) slabs, no unaligned sublane copies.
            band = x_ref[pl.ds(h0 + u, tile_h), :, lanes].astype(jnp.float32)
            for v in range(wz):
                # v-shift via an XLU sublane roll (clean vrot: wx_pad % 8 == 0)
                #   roll(band, wx_pad - v, axis=1)[:, j, :] == band[:, j+v, :]
                # for j < wo; wrapped columns j >= wo are discarded at store.
                shifted = band if v == 0 else pltpu.roll(
                    band, shift=wx_pad - v, axis=1)
                # Template factor: plain sublane-dense row load (vld slots,
                # idle) -> no XLU broadcast; only a major-dim broadcast left.
                zrow = z_ref[u * wz + v, :, lanes].astype(jnp.float32)
                acc = acc + shifted * zrow
        # Lane axis last and 128-wide -> lane-dense stores.
        o_ref[:, :, lanes] = acc[:, :wo, :].astype(o_ref.dtype)

    if n_chunks == 1:
        do_chunk(0)
    else:
        # Chunk the lanes 128 at a time so vreg pressure stays bounded while
        # the larger channel block amortizes pipeline-step overhead.
        @pl.loop(0, n_chunks)
        def _(lc):
            do_chunk(pl.multiple_of(lc * lane_chunk, lane_chunk))


def rpn_xcorr_channels_last(z_cl, x_cl, *, bc_block=512, tile_h_max=8,
                            vreg_budget=48):
    """Depthwise cross-correlation on channels-last features (fast path).

    Args:
      z_cl: (Hz, Wz, BC) template features, BC = fused batch*channels (lanes).
      x_cl: (Hx, Wx, BC) search features.
    Returns:
      (Ho, Wo, BC) with Ho = Hx - Hz + 1, Wo = Wx - Wz + 1.
    """
    hz, wz, bc = z_cl.shape
    hx, wx, bcx = x_cl.shape
    assert bc == bcx
    ho, wo = hx - hz + 1, wx - wz + 1
    assert ho >= 1 and wo >= 1

    # ---- channel (lane) blocking -------------------------------------------
    if bc % 128 == 0:
        bcb = min(bc, max(128, (bc_block // 128) * 128))
        while bc % bcb:
            bcb -= 128
    else:
        # TODO(synk): lane-sparse masked stores; fuse B*C to a multiple of 128
        # upstream for full-width vst.
        bcb = bc
    lane_chunk = 128 if bcb % 128 == 0 else bcb
    n_chunks = bcb // lane_chunk

    # ---- spatial padding / band sizing -------------------------------------
    # W padded to a multiple of 8 -> every pltpu.roll is a clean vrot.
    wx_pad = -(-wx // 8) * 8
    # tile_h from a vreg budget: acc + band + shifted are live simultaneously.
    per_row_vregs = 3 * (wx_pad // 8) * max(1, lane_chunk // 128)
    tile_h = max(1, min(tile_h_max, ho, vreg_budget // per_row_vregs))
    n_bands = -(-ho // tile_h)
    # H padded so the clipped tail band's reads stay in-bounds.
    hx_pad = n_bands * tile_h + hz - 1

    x_p = x_cl
    if (hx_pad, wx_pad) != (hx, wx):
        x_p = jnp.pad(x_cl, ((0, hx_pad - hx), (0, wx_pad - wx), (0, 0)))

    # Pre-broadcast the template taps along the sublane axis (see header).
    z_bc = jnp.broadcast_to(
        z_cl.reshape(hz * wz, 1, bc), (hz * wz, wx_pad, bc))

    kernel = functools.partial(
        _xcorr_kernel, hz=hz, wz=wz, wx_pad=wx_pad, wo=wo, tile_h=tile_h,
        lane_chunk=lane_chunk, n_chunks=n_chunks)

    grid = (bc // bcb, n_bands)
    return pl.pallas_call(
        kernel,
        out_shape=jax.ShapeDtypeStruct((ho, wo, bc), x_cl.dtype),
        grid=grid,
        in_specs=[
            pl.BlockSpec((hz * wz, wx_pad, bcb), lambda cb, hb: (0, 0, cb)),
            pl.BlockSpec((hx_pad, wx_pad, bcb), lambda cb, hb: (0, 0, cb)),
        ],
        out_specs=pl.BlockSpec((tile_h, wo, bcb), lambda cb, hb: (hb, 0, cb)),
        compiler_params=pltpu.CompilerParams(
            # TODO(synk): on v7x use CORE_PARALLEL on an even-extent axis so
            # both TensorCores split the work.
            dimension_semantics=("parallel", "parallel")),
    )(z_bc, x_p)


def rpn_xcorr(z_f, x_f):
    """NCHW adapter matching the PyTorch convention.

    Args:
      z_f: (B, C, Hz, Wz)  template features, NCHW.
      x_f: (B, C, Hx, Wx)  search   features, NCHW.
    Returns:
      (B, C, Ho, Wo) valid cross-correlation map.

    NOTE: the relayouts below are pure glue for the PyTorch NCHW interface.
    In a full model the upstream backbone should emit channels-last features
    and call `rpn_xcorr_channels_last` directly, which is transpose-free.
    """
    b, c, hz, wz = z_f.shape
    bx, cx, hx, wx = x_f.shape
    assert b == bx and c == cx
    ho, wo = hx - hz + 1, wx - wz + 1

    z_cl = jnp.transpose(z_f, (2, 3, 0, 1)).reshape(hz, wz, b * c)
    x_cl = jnp.transpose(x_f, (2, 3, 0, 1)).reshape(hx, wx, b * c)

    out_cl = rpn_xcorr_channels_last(z_cl, x_cl)

    return jnp.transpose(out_cl.reshape(ho, wo, b, c), (2, 3, 0, 1))


class RPN:
    """JAX/Pallas analogue of the PyTorch `RPN` base module.

    The PyTorch base forward is abstract; this implements the canonical
    depthwise cross-correlation forward of the CrossCorr RPN family.
    """

    def __call__(self, z_f, x_f):
        return rpn_xcorr(z_f, x_f)


def _reference_xcorr_nchw(z_f, x_f):
    """Pure-JAX reference (same semantics) for validation."""
    b, c, hz, wz = z_f.shape
    _, _, hx, wx = x_f.shape
    ho, wo = hx - hz + 1, wx - wz + 1
    out = jnp.zeros((b, c, ho, wo), jnp.float32)
    for u in range(hz):
        for v in range(wz):
            out = out + (x_f[:, :, u:u + ho, v:v + wo].astype(jnp.float32)
                         * z_f[:, :, u:u + 1, v:v + 1].astype(jnp.float32))
    return out.astype(x_f.dtype)


if __name__ == "__main__":
    key = jax.random.PRNGKey(0)
    kz, kx = jax.random.split(key)

    B, C = 2, 64        # B*C = 128 -> exactly one lane-dense channel block
    HZ, WZ = 4, 4       # template spatial size
    HX, WX = 12, 12     # search spatial size -> 9 x 9 output

    z_f = jax.random.normal(kz, (B, C, HZ, WZ), dtype=jnp.float32)
    x_f = jax.random.normal(kx, (B, C, HX, WX), dtype=jnp.float32)

    rpn = RPN()
    fwd = jax.jit(rpn.__call__)
    out = jax.block_until_ready(fwd(z_f, x_f))
    ref = _reference_xcorr_nchw(z_f, x_f)

    assert out.shape == (B, C, HX - HZ + 1, WX - WZ + 1)
    assert jnp.allclose(out, ref, atol=1e-4, rtol=1e-4), float(
        jnp.max(jnp.abs(out.astype(jnp.float32) - ref.astype(jnp.float32))))

    print("KERNEL_OK")
</pallas_src>

<mosaic_0001>
module attributes {stable_mosaic.version = 11 : i64} {
  func.func @_xcorr_kernel(%arg0: i32, %arg1: i32, %arg2: memref<16x16x128xf32, #tpu.memory_space<vmem>>, %arg3: memref<19x16x128xf32, #tpu.memory_space<vmem>>, %arg4: memref<8x9x128xf32, #tpu.memory_space<vmem>>) attributes {dimension_semantics = [#tpu.dimension_semantics<parallel>, #tpu.dimension_semantics<parallel>], iteration_bounds = array<i64: 1, 2>, scalar_prefetch = 0 : i64, scratch_operands = 0 : i64, tpu.core_type = #tpu.core_type<tc>, window_params = [{transform_indices = @transform_0, window_bounds = array<i64: 16, 16, 128>}, {transform_indices = @transform_1, window_bounds = array<i64: 19, 16, 128>}, {transform_indices = @transform_2, window_bounds = array<i64: 8, 9, 128>}]} {
    %c8_i32 = arith.constant 8 : i32
    %0 = arith.muli %arg1, %c8_i32 : i32
    %cst = arith.constant 0.000000e+00 : f32
    %1 = vector.broadcast %cst : f32 to vector<8x16x128xf32>
    %c0_i32 = arith.constant 0 : i32
    %2 = arith.addi %0, %c0_i32 : i32
    %3 = arith.index_cast %2 : i32 to index
    %c0 = arith.constant 0 : index
    %c0_0 = arith.constant 0 : index
    %4 = vector.load %arg3[%3, %c0, %c0_0] : memref<19x16x128xf32, #tpu.memory_space<vmem>>, vector<8x16x128xf32>
    %c0_1 = arith.constant 0 : index
    %c0_2 = arith.constant 0 : index
    %c0_3 = arith.constant 0 : index
    %5 = vector.load %arg2[%c0_1, %c0_2, %c0_3] : memref<16x16x128xf32, #tpu.memory_space<vmem>>, vector<1x16x128xf32>
    %6 = vector.shape_cast %5 : vector<1x16x128xf32> to vector<16x128xf32>
    %7 = vector.shape_cast %6 : vector<16x128xf32> to vector<1x16x128xf32>
    %8 = vector.broadcast %7 : vector<1x16x128xf32> to vector<8x16x128xf32>
    %9 = arith.mulf %4, %8 : vector<8x16x128xf32>
    %10 = arith.addf %1, %9 : vector<8x16x128xf32>
    %c15_i32 = arith.constant 15 : i32
    %11 = tpu.dynamic_rotate %4 by %c15_i32 dim 1 : vector<8x16x128xf32>, i32 -> vector<8x16x128xf32>
    %c1 = arith.constant 1 : index
    %c0_4 = arith.constant 0 : index
    %c0_5 = arith.constant 0 : index
    %12 = vector.load %arg2[%c1, %c0_4, %c0_5] : memref<16x16x128xf32, #tpu.memory_space<vmem>>, vector<1x16x128xf32>
    %13 = vector.shape_cast %12 : vector<1x16x128xf32> to vector<16x128xf32>
    %14 = vector.shape_cast %13 : vector<16x128xf32> to vector<1x16x128xf32>
    %15 = vector.broadcast %14 : vector<1x16x128xf32> to vector<8x16x128xf32>
    %16 = arith.mulf %11, %15 : vector<8x16x128xf32>
    %17 = arith.addf %10, %16 : vector<8x16x128xf32>
    %c14_i32 = arith.constant 14 : i32
    %18 = tpu.dynamic_rotate %4 by %c14_i32 dim 1 : vector<8x16x128xf32>, i32 -> vector<8x16x128xf32>
    %c2 = arith.constant 2 : index
    %c0_6 = arith.constant 0 : index
    %c0_7 = arith.constant 0 : index
    %19 = vector.load %arg2[%c2, %c0_6, %c0_7] : memref<16x16x128xf32, #tpu.memory_space<vmem>>, vector<1x16x128xf32>
    %20 = vector.shape_cast %19 : vector<1x16x128xf32> to vector<16x128xf32>
    %21 = vector.shape_cast %20 : vector<16x128xf32> to vector<1x16x128xf32>
    %22 = vector.broadcast %21 : vector<1x16x128xf32> to vector<8x16x128xf32>
    %23 = arith.mulf %18, %22 : vector<8x16x128xf32>
    %24 = arith.addf %17, %23 : vector<8x16x128xf32>
    %c13_i32 = arith.constant 13 : i32
    %25 = tpu.dynamic_rotate %4 by %c13_i32 dim 1 : vector<8x16x128xf32>, i32 -> vector<8x16x128xf32>
    %c3 = arith.constant 3 : index
    %c0_8 = arith.constant 0 : index
    %c0_9 = arith.constant 0 : index
    %26 = vector.load %arg2[%c3, %c0_8, %c0_9] : memref<16x16x128xf32, #tpu.memory_space<vmem>>, vector<1x16x128xf32>
    %27 = vector.shape_cast %26 : vector<1x16x128xf32> to vector<16x128xf32>
    %28 = vector.shape_cast %27 : vector<16x128xf32> to vector<1x16x128xf32>
    %29 = vector.broadcast %28 : vector<1x16x128xf32> to vector<8x16x128xf32>
    %30 = arith.mulf %25, %29 : vector<8x16x128xf32>
    %31 = arith.addf %24, %30 : vector<8x16x128xf32>
    %c1_i32 = arith.constant 1 : i32
    %32 = arith.addi %0, %c1_i32 : i32
    %33 = arith.index_cast %32 : i32 to index
    %c0_10 = arith.constant 0 : index
    %c0_11 = arith.constant 0 : index
    %34 = vector.load %arg3[%33, %c0_10, %c0_11] : memref<19x16x128xf32, #tpu.memory_space<vmem>>, vector<8x16x128xf32>
    %c4 = arith.constant 4 : index
    %c0_12 = arith.constant 0 : index
    %c0_13 = arith.constant 0 : index
    %35 = vector.load %arg2[%c4, %c0_12, %c0_13] : memref<16x16x128xf32, #tpu.memory_space<vmem>>, vector<1x16x128xf32>
    %36 = vector.shape_cast %35 : vector<1x16x128xf32> to vector<16x128xf32>
    %37 = vector.shape_cast %36 : vector<16x128xf32> to vector<1x16x128xf32>
    %38 = vector.broadcast %37 : vector<1x16x128xf32> to vector<8x16x128xf32>
    %39 = arith.mulf %34, %38 : vector<8x16x128xf32>
    %40 = arith.addf %31, %39 : vector<8x16x128xf32>
    %c15_i32_14 = arith.constant 15 : i32
    %41 = tpu.dynamic_rotate %34 by %c15_i32_14 dim 1 : vector<8x16x128xf32>, i32 -> vector<8x16x128xf32>
    %c5 = arith.constant 5 : index
    %c0_15 = arith.constant 0 : index
    %c0_16 = arith.constant 0 : index
    %42 = vector.load %arg2[%c5, %c0_15, %c0_16] : memref<16x16x128xf32, #tpu.memory_space<vmem>>, vector<1x16x128xf32>
    %43 = vector.shape_cast %42 : vector<1x16x128xf32> to vector<16x128xf32>
    %44 = vector.shape_cast %43 : vector<16x128xf32> to vector<1x16x128xf32>
    %45 = vector.broadcast %44 : vector<1x16x128xf32> to vector<8x16x128xf32>
    %46 = arith.mulf %41, %45 : vector<8x16x128xf32>
    %47 = arith.addf %40, %46 : vector<8x16x128xf32>
    %c14_i32_17 = arith.constant 14 : i32
    %48 = tpu.dynamic_rotate %34 by %c14_i32_17 dim 1 : vector<8x16x128xf32>, i32 -> vector<8x16x128xf32>
    %c6 = arith.constant 6 : index
    %c0_18 = arith.constant 0 : index
    %c0_19 = arith.constant 0 : index
    %49 = vector.load %arg2[%c6, %c0_18, %c0_19] : memref<16x16x128xf32, #tpu.memory_space<vmem>>, vector<1x16x128xf32>
    %50 = vector.shape_cast %49 : vector<1x16x128xf32> to vector<16x128xf32>
    %51 = vector.shape_cast %50 : vector<16x128xf32> to vector<1x16x128xf32>
    %52 = vector.broadcast %51 : vector<1x16x128xf32> to vector<8x16x128xf32>
    %53 = arith.mulf %48, %52 : vector<8x16x128xf32>
    %54 = arith.addf %47, %53 : vector<8x16x128xf32>
    %c13_i32_20 = arith.constant 13 : i32
    %55 = tpu.dynamic_rotate %34 by %c13_i32_20 dim 1 : vector<8x16x128xf32>, i32 -> vector<8x16x128xf32>
    %c7 = arith.constant 7 : index
    %c0_21 = arith.constant 0 : index
    %c0_22 = arith.constant 0 : index
    %56 = vector.load %arg2[%c7, %c0_21, %c0_22] : memref<16x16x128xf32, #tpu.memory_space<vmem>>, vector<1x16x128xf32>
    %57 = vector.shape_cast %56 : vector<1x16x128xf32> to vector<16x128xf32>
    %58 = vector.shape_cast %57 : vector<16x128xf32> to vector<1x16x128xf32>
    %59 = vector.broadcast %58 : vector<1x16x128xf32> to vector<8x16x128xf32>
    %60 = arith.mulf %55, %59 : vector<8x16x128xf32>
    %61 = arith.addf %54, %60 : vector<8x16x128xf32>
    %c2_i32 = arith.constant 2 : i32
    %62 = arith.addi %0, %c2_i32 : i32
    %63 = arith.index_cast %62 : i32 to index
    %c0_23 = arith.constant 0 : index
    %c0_24 = arith.constant 0 : index
    %64 = vector.load %arg3[%63, %c0_23, %c0_24] : memref<19x16x128xf32, #tpu.memory_space<vmem>>, vector<8x16x128xf32>
    %c8 = arith.constant 8 : index
    %c0_25 = arith.constant 0 : index
    %c0_26 = arith.constant 0 : index
    %65 = vector.load %arg2[%c8, %c0_25, %c0_26] : memref<16x16x128xf32, #tpu.memory_space<vmem>>, vector<1x16x128xf32>
    %66 = vector.shape_cast %65 : vector<1x16x128xf32> to vector<16x128xf32>
    %67 = vector.shape_cast %66 : vector<16x128xf32> to vector<1x16x128xf32>
    %68 = vector.broadcast %67 : vector<1x16x128xf32> to vector<8x16x128xf32>
    %69 = arith.mulf %64, %68 : vector<8x16x128xf32>
    %70 = arith.addf %61, %69 : vector<8x16x128xf32>
    %c15_i32_27 = arith.constant 15 : i32
    %71 = tpu.dynamic_rotate %64 by %c15_i32_27 dim 1 : vector<8x16x128xf32>, i32 -> vector<8x16x128xf32>
    %c9 = arith.constant 9 : index
    %c0_28 = arith.constant 0 : index
    %c0_29 = arith.constant 0 : index
    %72 = vector.load %arg2[%c9, %c0_28, %c0_29] : memref<16x16x128xf32, #tpu.memory_space<vmem>>, vector<1x16x128xf32>
    %73 = vector.shape_cast %72 : vector<1x16x128xf32> to vector<16x128xf32>
    %74 = vector.shape_cast %73 : vector<16x128xf32> to vector<1x16x128xf32>
    %75 = vector.broadcast %74 : vector<1x16x128xf32> to vector<8x16x128xf32>
    %76 = arith.mulf %71, %75 : vector<8x16x128xf32>
    %77 = arith.addf %70, %76 : vector<8x16x128xf32>
    %c14_i32_30 = arith.constant 14 : i32
    %78 = tpu.dynamic_rotate %64 by %c14_i32_30 dim 1 : vector<8x16x128xf32>, i32 -> vector<8x16x128xf32>
    %c10 = arith.constant 10 : index
    %c0_31 = arith.constant 0 : index
    %c0_32 = arith.constant 0 : index
    %79 = vector.load %arg2[%c10, %c0_31, %c0_32] : memref<16x16x128xf32, #tpu.memory_space<vmem>>, vector<1x16x128xf32>
    %80 = vector.shape_cast %79 : vector<1x16x128xf32> to vector<16x128xf32>
    %81 = vector.shape_cast %80 : vector<16x128xf32> to vector<1x16x128xf32>
    %82 = vector.broadcast %81 : vector<1x16x128xf32> to vector<8x16x128xf32>
    %83 = arith.mulf %78, %82 : vector<8x16x128xf32>
    %84 = arith.addf %77, %83 : vector<8x16x128xf32>
    %c13_i32_33 = arith.constant 13 : i32
    %85 = tpu.dynamic_rotate %64 by %c13_i32_33 dim 1 : vector<8x16x128xf32>, i32 -> vector<8x16x128xf32>
    %c11 = arith.constant 11 : index
    %c0_34 = arith.constant 0 : index
    %c0_35 = arith.constant 0 : index
    %86 = vector.load %arg2[%c11, %c0_34, %c0_35] : memref<16x16x128xf32, #tpu.memory_space<vmem>>, vector<1x16x128xf32>
    %87 = vector.shape_cast %86 : vector<1x16x128xf32> to vector<16x128xf32>
    %88 = vector.shape_cast %87 : vector<16x128xf32> to vector<1x16x128xf32>
    %89 = vector.broadcast %88 : vector<1x16x128xf32> to vector<8x16x128xf32>
    %90 = arith.mulf %85, %89 : vector<8x16x128xf32>
    %91 = arith.addf %84, %90 : vector<8x16x128xf32>
    %c3_i32 = arith.constant 3 : i32
    %92 = arith.addi %0, %c3_i32 : i32
    %93 = arith.index_cast %92 : i32 to index
    %c0_36 = arith.constant 0 : index
    %c0_37 = arith.constant 0 : index
    %94 = vector.load %arg3[%93, %c0_36, %c0_37] : memref<19x16x128xf32, #tpu.memory_space<vmem>>, vector<8x16x128xf32>
    %c12 = arith.constant 12 : index
    %c0_38 = arith.constant 0 : index
    %c0_39 = arith.constant 0 : index
    %95 = vector.load %arg2[%c12, %c0_38, %c0_39] : memref<16x16x128xf32, #tpu.memory_space<vmem>>, vector<1x16x128xf32>
    %96 = vector.shape_cast %95 : vector<1x16x128xf32> to vector<16x128xf32>
    %97 = vector.shape_cast %96 : vector<16x128xf32> to vector<1x16x128xf32>
    %98 = vector.broadcast %97 : vector<1x16x128xf32> to vector<8x16x128xf32>
    %99 = arith.mulf %94, %98 : vector<8x16x128xf32>
    %100 = arith.addf %91, %99 : vector<8x16x128xf32>
    %c15_i32_40 = arith.constant 15 : i32
    %101 = tpu.dynamic_rotate %94 by %c15_i32_40 dim 1 : vector<8x16x128xf32>, i32 -> vector<8x16x128xf32>
    %c13 = arith.constant 13 : index
    %c0_41 = arith.constant 0 : index
    %c0_42 = arith.constant 0 : index
    %102 = vector.load %arg2[%c13, %c0_41, %c0_42] : memref<16x16x128xf32, #tpu.memory_space<vmem>>, vector<1x16x128xf32>
    %103 = vector.shape_cast %102 : vector<1x16x128xf32> to vector<16x128xf32>
    %104 = vector.shape_cast %103 : vector<16x128xf32> to vector<1x16x128xf32>
    %105 = vector.broadcast %104 : vector<1x16x128xf32> to vector<8x16x128xf32>
    %106 = arith.mulf %101, %105 : vector<8x16x128xf32>
    %107 = arith.addf %100, %106 : vector<8x16x128xf32>
    %c14_i32_43 = arith.constant 14 : i32
    %108 = tpu.dynamic_rotate %94 by %c14_i32_43 dim 1 : vector<8x16x128xf32>, i32 -> vector<8x16x128xf32>
    %c14 = arith.constant 14 : index
    %c0_44 = arith.constant 0 : index
    %c0_45 = arith.constant 0 : index
    %109 = vector.load %arg2[%c14, %c0_44, %c0_45] : memref<16x16x128xf32, #tpu.memory_space<vmem>>, vector<1x16x128xf32>
    %110 = vector.shape_cast %109 : vector<1x16x128xf32> to vector<16x128xf32>
    %111 = vector.shape_cast %110 : vector<16x128xf32> to vector<1x16x128xf32>
    %112 = vector.broadcast %111 : vector<1x16x128xf32> to vector<8x16x128xf32>
    %113 = arith.mulf %108, %112 : vector<8x16x128xf32>
    %114 = arith.addf %107, %113 : vector<8x16x128xf32>
    %c13_i32_46 = arith.constant 13 : i32
    %115 = tpu.dynamic_rotate %94 by %c13_i32_46 dim 1 : vector<8x16x128xf32>, i32 -> vector<8x16x128xf32>
    %c15 = arith.constant 15 : index
    %c0_47 = arith.constant 0 : index
    %c0_48 = arith.constant 0 : index
    %116 = vector.load %arg2[%c15, %c0_47, %c0_48] : memref<16x16x128xf32, #tpu.memory_space<vmem>>, vector<1x16x128xf32>
    %117 = vector.shape_cast %116 : vector<1x16x128xf32> to vector<16x128xf32>
    %118 = vector.shape_cast %117 : vector<16x128xf32> to vector<1x16x128xf32>
    %119 = vector.broadcast %118 : vector<1x16x128xf32> to vector<8x16x128xf32>
    %120 = arith.mulf %115, %119 : vector<8x16x128xf32>
    %121 = arith.addf %114, %120 : vector<8x16x128xf32>
    %122 = vector.extract_strided_slice %121 {offsets = [0, 0, 0], sizes = [8, 9, 128], strides = [1, 1, 1]} : vector<8x16x128xf32> to vector<8x9x128xf32>
    %c0_49 = arith.constant 0 : index
    %c0_50 = arith.constant 0 : index
    %c0_51 = arith.constant 0 : index
    %123 = vector.load %arg4[%c0_49, %c0_50, %c0_51] : memref<8x9x128xf32, #tpu.memory_space<vmem>>, vector<8x9x128xf32>
    tpu.vector_store %arg4[%c0_49, %c0_50, %c0_51], %122 {strides = array<i32>} : memref<8x9x128xf32, #tpu.memory_space<vmem>>, vector<8x9x128xf32>,
    return
  }
  func.func @transform_0(%arg0: i32, %arg1: i32) -> (i32, i32, i32) {
    %c0_i32 = arith.constant 0 : i32
    %c0_i32_0 = arith.constant 0 : i32
    %c0_i32_1 = arith.constant 0 : i32
    return %c0_i32, %c0_i32_0, %arg0 : i32, i32, i32
  }
  func.func @transform_1(%arg0: i32, %arg1: i32) -> (i32, i32, i32) {
    %c0_i32 = arith.constant 0 : i32
    %c0_i32_0 = arith.constant 0 : i32
    %c0_i32_1 = arith.constant 0 : i32
    return %c0_i32, %c0_i32_0, %arg0 : i32, i32, i32
  }
  func.func @transform_2(%arg0: i32, %arg1: i32) -> (i32, i32, i32) {
    %c0_i32 = arith.constant 0 : i32
    %c0_i32_0 = arith.constant 0 : i32
    return %arg1, %c0_i32, %arg0 : i32, i32, i32
  }
}

</mosaic_0001>

<bundles_post_ra>
// kernel: a_call__.1
= control target key start
LH: loop header
LB: loop body
LE: loop exit
PB: predicated region body
PF: predicated region fallthrough
CT: control target
= control target key end

     0   :  { %s1910_s9 = smov 0   ;;  %s1912_s10 = smov 0   ;;  %s3266_s0 = inlined_call_operand.vmem [shape: f32[16,16,128], index: 0, kind: input, shape index: {}]   ;;  %s3267_s1 = inlined_call_operand.vmem [shape: f32[19,16,128], index: 1, kind: input, shape index: {}]   ;;  %s3268_s2 = inlined_call_operand.vmem [shape: f32[9,9,128], index: 2, kind: output, shape index: {}]  }
   0x1   :  { %s1914_s11 = smov 0   ;;  %s1916_s12 = smov 0  }
   0x2   :  { %s1918_s13 = smov 0  }
   0x3 LB: > { %s1533_s14 = sadd.s32 4294967295, %s1861_s13   ;;  %s21_s15 = sadd.s32 1, %s1857_s12  ;;  %s1861_s13 = sphi %s1918_s13, %s12_s13   ;;  %s1857_s12 = sphi %s1916_s12, %s3470_s12   ;;  %s1853_s11 = sphi %s1914_s11, %s3469_s11   ;;  %s1849_s10 = sphi %s1912_s10, %s3468_s10   ;;  %s1845_s9 = sphi %s1910_s9, %s3467_s9  }
   0x4   : > { %p22_p0 = scmp.ge.s32.totalorder %s21_s15, 2  ;;  %s85_s16 = sadd.s32 1, %s1849_s10 }
   0x5   : > { %p95_p1 = scmp.ne.s32.totalorder %s1849_s10, %s1845_s9  ;;  %p96_p2 = scmp.eq.s32.totalorder %s1533_s14, 1 }
   0x6   : > { %s3472_s15 = smov (%p22_p0, %s21_s15), 0  ;;  %p1538_p4 = scmp.ge.s32.totalorder %s1861_s13, 1 }
   0x7   : > { %p1942_p3 = por %p96_p2, %p95_p1  ;;  %s80_s18 = ssub.s32 %s1857_s12, %s3472_s15 }
   0x8   : > { %p134_p5 = scmp.lt.s32.totalorder %s1861_s13, 3  ;;  %p83_p6 = scmp.eq.s32.totalorder %s80_s18, 0 }
   0xa   : > { %p135_p7 = pnand %p1538_p4, %p134_p5 }
   0xb   : > { %s1951_s19 = scalar_select %p83_p6, %s1849_s10, %s85_s16  }
   0xc   : > { %138 = sbr.rel (%p135_p7) target bundleno = 246 (0xf6), region = 28 }
  0x13   : > { %s1646_s20 = sshll.u32 %s1853_s11, 7  ;;  %v1957_v0 = vld [vmem:[%s3266_s0] sm:$0xff]  ;;  %v241_v1 = vlaneseq  ;;  %v1981_v8 = vld [vmem:[%s3266_s0 + $0x10] sm:$0xff]  ;;  %v2079_v45 = vld [vmem:[%s3266_s0 + $0x8] sm:$0xff]  ;;  %s155_s21 = sand.u32 1, %s1845_s9  }
  0x14   : > { %3346 = vst [vmem:[#allocation3_spill] sm:$0xff] %v1957_v0  ;;  %s1964_s25 = scalar_lea.vmem %s3267_s1, %s1646_s20  ;;  %3347 = vst [vmem:[#allocation4_spill] sm:$0xff] %v1981_v8  ;;  %v1987_v10 = vld [vmem:[%s3266_s0 + $0x20] sm:$0xff]  ;;  %v2006_v17 = vld [vmem:[%s3266_s0 + $0x30] sm:$0xff]  ;;  %s1539_s28 = sshll.u32 %s155_s21, 7 }
  0x15   : > { %v1967_v2 = vld [vmem:[%s1964_s25] sm:$0xff]  ;;  %v1970_v3 = vld [vmem:[%s1964_s25 + $0x8] sm:$0xff]  ;;  %v1972_v4 = vshrl.u32 %v241_v1, 7  ;;  %v1994_v13 = vld [vmem:[%s1964_s25 + $0x10] sm:$0xff]  ;;  %3348 = vst [vmem:[#allocation5_spill] sm:$0xff] %v2006_v17  ;;  %s2409_s7 = scalar_lea.vmem [#allocation2], %s1539_s28   ;;  %s3165_s27 = scalar_lea.vmem (%p1942_p3), %s3268_s2, %s1646_s20  }
  0x16   : > { %v193_v5 = vmul.f32 %v1957_v0, %v1967_v2  ;;  %v225_v6 = vrot.slane %v1967_v2, 1  ;;  %v233_v7 = vrot.slane %v1970_v3, 1  ;;  %v295_v9 = vrot.slane %v1967_v2, 2  ;;  %v1997_v14 = vld [vmem:[%s1964_s25 + $0x18] sm:$0xff]  ;;  %v2019_v22 = vld [vmem:[%s3266_s0 + $0x40] sm:$0xff]  ;;  %v2027_v27 = vld [vmem:[%s3266_s0 + $0x50] sm:$0xff] }
  0x17   : > { %vm243_vm0 = vcmp.lt.s32.totalorder %v1972_v4, 7  ;;  %v303_v11 = vrot.slane %v1970_v3, 2  ;;  %vm311_vm1 = vcmp.lt.s32.totalorder %v1972_v4, 6  ;;  %v363_v12 = vrot.slane %v1967_v2, 3  ;;  %3349 = vst [vmem:[#allocation6_spill] sm:$0xff] %v2019_v22  ;;  %3350 = vst [vmem:[#allocation7_spill] sm:$0xff] %v2027_v27 }
  0x18   : > { %v244_v15 = vsel %vm243_vm0, %v225_v6, %v233_v7  ;;  %v371_v16 = vrot.slane %v1970_v3, 3  ;;  %vm379_vm2 = vcmp.lt.s32.totalorder %v1972_v4, 5  ;;  %v485_v23 = vrot.slane %v1994_v13, 1  ;;  %v2034_v32 = vld [vmem:[%s1964_s25 + $0x20] sm:$0xff]  ;;  %v2037_v33 = vld [vmem:[%s1964_s25 + $0x28] sm:$0xff]  ;;  %v2072_v42 = vld [vmem:[%s3266_s0 + $0x70] sm:$0xff] }
  0x19   : > { %v263_v18 = vmul.f32 %v1981_v8, %v244_v15  ;;  %v312_v19 = vsel %vm311_vm1, %v295_v9, %v303_v11  ;;  %v493_v24 = vrot.slane %v1997_v14, 1  ;;  %v552_v28 = vrot.slane %v1994_v13, 2  ;;  %v2050_v35 = vld [vmem:[%s3266_s0 + $0x60] sm:$0xff]  ;;  %3353 = vst [vmem:[#allocation10_spill] sm:$0xff] %v2072_v42  ;;  %3354 = vst [vmem:[#allocation11_spill] sm:$0xff] %v2079_v45  ;;  %v2096_v50 = vld [vmem:[%s3266_s0 + $0x90] sm:$0xff] }
  0x1a   : > { %v331_v20 = vmul.f32 %v1987_v10, %v312_v19  ;;  %v380_v21 = vsel %vm379_vm2, %v363_v12, %v371_v16  ;;  %v560_v29 = vrot.slane %v1997_v14, 2  ;;  %v453_v31 = vmul.f32 %v2019_v22, %v1994_v13  ;;  %3351 = vst [vmem:[#allocation8_spill] sm:$0xff] %v2050_v35  ;;  %v2059_v40 = vld [vmem:[%s3266_s0 + $0x80] sm:$0xff]  ;;  %3355 = vst [vmem:[#allocation12_spill] sm:$0xff] %v2096_v50  ;;  %v2102_v52 = vld [vmem:[%s3266_s0 + $0x18] sm:$0xff] }
  0x1b   : > { %v279_v25 = vadd.f32 %v263_v18, %v193_v5  ;;  %v399_v26 = vmul.f32 %v2006_v17, %v380_v21  ;;  %v2045_v34 = vsel %vm243_vm0, %v485_v23, %v493_v24  ;;  %v619_v36 = vrot.slane %v1994_v13, 3  ;;  %3352 = vst [vmem:[#allocation9_spill] sm:$0xff] %v2059_v40  ;;  %3356 = vst [vmem:[#allocation13_spill] sm:$0xff] %v2102_v52  ;;  %v2108_v56 = vld [vmem:[%s1964_s25 + $0x30] sm:$0xff]  ;;  %v2111_v57 = vld [vmem:[%s1964_s25 + $0x38] sm:$0xff] }
  0x1c   : > { %v627_v37 = vrot.slane %v1997_v14, 3  ;;  %v520_v39 = vmul.f32 %v2027_v27, %v2045_v34  ;;  %v2067_v41 = vsel %vm311_vm1, %v552_v28, %v560_v29  ;;  %v740_v43 = vrot.slane %v2034_v32, 1  ;;  %v2118_v59 = vld [vmem:[%s3266_s0 + $0x28] sm:$0xff]  ;;  %v2136_v1 = vld [vmem:[%s3266_s0 + $0x38] sm:$0xff]  ;;  %v2143_v15 = vld [vmem:[%s3266_s0 + $0xa0] sm:$0xff] }
  0x1d   : > { %v347_v30 = vadd.f32 %v331_v20, %v279_v25  ;;  %v748_v44 = vrot.slane %v2037_v33, 1  ;;  %v587_v47 = vmul.f32 %v2050_v35, %v2067_v41  ;;  %v708_v49 = vmul.f32 %v2059_v40, %v2034_v32  ;;  %3357 = vst [vmem:[#allocation14_spill] sm:$0xff] %v2118_v59  ;;  %3358 = vst [vmem:[#allocation15_spill] sm:$0xff] %v2136_v1  ;;  %v2157_v20 = vld [vmem:[%s3266_s0 + $0x48] sm:$0xff]  ;;  %v2170_v2 = vld [vmem:[%s3266_s0 + $0xb0] sm:$0xff] }
  0x1e   : > { %v2089_v48 = vsel %vm379_vm2, %v619_v36, %v627_v37  ;;  %v3276_v51 = vrot.slane %v2034_v32, 2  ;;  %v3275_v55 = vrot.slane %v2037_v33, 2  ;;  %v194_v58 = vmul.f32 %v2079_v45, %v1970_v3  ;;  %3359 = vst [vmem:[#allocation16_spill] sm:$0xff] %v2143_v15  ;;  %3360 = vst [vmem:[#allocation17_spill] sm:$0xff] %v2157_v20 }
  0x1f   : > { %v415_v38 = vadd.f32 %v399_v26, %v347_v30  ;;  %v654_v54 = vmul.f32 %v2072_v42, %v2089_v48  ;;  %v2126_v60 = vsel %vm243_vm0, %v740_v43, %v748_v44  ;;  %v3274_v61 = vrot.slane %v2034_v32, 3  ;;  %3361 = vst [vmem:[#allocation18_spill] sm:$0xff] %v2170_v2 }
  0x20   : > { %v252_v62 = vsel %vm243_vm0, %v233_v7, %v225_v6  ;;  %v320_v63 = vsel %vm311_vm1, %v303_v11, %v295_v9  ;;  %v775_v5 = vmul.f32 %v2096_v50, %v2126_v60  ;;  %v3271_v18 = vrot.slane %v2037_v33, 3 }
  0x21   : > { %v469_v46 = vadd.f32 %v453_v31, %v415_v38  ;;  %v264_v6 = vmul.f32 %v2102_v52, %v252_v62  ;;  %v3270_v7 = vrot.slane %v2108_v56, 1  ;;  %v3269_v9 = vrot.slane %v2111_v57, 1  ;;  %v2180_v38 = vld [vmem:[%s3266_s0 + $0x58] sm:$0xff] }
  0x22   : > { %v332_v11 = vmul.f32 %v2118_v59, %v320_v63  ;;  %v388_v19 = vsel %vm379_vm2, %v371_v16, %v363_v12  ;;  %v2165_v25 = vsel %vm311_vm1, %v3276_v51, %v3275_v55  ;;  %v3273_v30 = vrot.slane %v2108_v56, 2  ;;  %3362 = vst [vmem:[#allocation19_spill] sm:$0xff] %v2180_v38  ;;  %v2215_v63 = vld [vmem:[%s3266_s0 + $0xe0] sm:$0xff] }
  0x23   : > { %v536_v53 = vadd.f32 %v520_v39, %v469_v46  ;;  %v280_v12 = vadd.f32 %v264_v6, %v194_v58  ;;  %v400_v16 = vmul.f32 %v2136_v1, %v388_v19  ;;  %v842_v26 = vmul.f32 %v2143_v15, %v2165_v25  ;;  %3365 = vst [vmem:[#allocation22_spill] sm:$0xff] %v2215_v63 }
  0x24   : > { %v3272_v31 = vrot.slane %v2111_v57, 2  ;;  %v2188_v46 = vsel %vm379_vm2, %v3274_v61, %v3271_v18  ;;  %v2210_v62 = vsel %vm243_vm0, %v3270_v7, %v3269_v9  ;;  %v2224_v6 = vsel %vm243_vm0, %v493_v24, %v485_v23 }
  0x25   : > { %v603_v3 = vadd.f32 %v587_v47, %v536_v53  ;;  %v2193_v47 = vld [vmem:[%s3266_s0 + $0xc0] sm:$0xff]  ;;  %v2198_v53 = vld [vmem:[%s3266_s0 + $0xd0] sm:$0xff]  ;;  %v909_v58 = vmul.f32 %v2170_v2, %v2188_v46  ;;  %v521_v9 = vmul.f32 %v2180_v38, %v2224_v6  ;;  %v576_v24 = vsel %vm311_vm1, %v560_v29, %v552_v28  ;;  %v2268_v28 = vld [vmem:[%s3266_s0 + $0x88] sm:$0xff] }
  0x26   : > { %3363 = vst [vmem:[#allocation20_spill] sm:$0xff] %v2193_v47  ;;  %3364 = vst [vmem:[#allocation21_spill] sm:$0xff] %v2198_v53  ;;  %v963_v7 = vmul.f32 %v2193_v47, %v2108_v56  ;;  %v1030_v18 = vmul.f32 %v2198_v53, %v2210_v62  ;;  %v2244_v23 = vsel %vm311_vm1, %v3273_v30, %v3272_v31 }
  0x27   : > { %v670_v21 = vadd.f32 %v654_v54, %v603_v3  ;;  %v348_v54 = vadd.f32 %v332_v11, %v280_v12  ;;  %v1129_v3 = vrot.slane %v2108_v56, 3  ;;  %v2229_v11 = vld [vmem:[%s3266_s0 + $0x68] sm:$0xff]  ;;  %3369 = vst [vmem:[#allocation26_spill] sm:$0xff] %v2268_v28  ;;  %v2276_v29 = vsel %vm379_vm2, %v627_v37, %v619_v36  ;;  %v2303_v37 = vld [vmem:[%s3266_s0 + $0x98] sm:$0xff] }
  0x28   : > { %3366 = vst [vmem:[#allocation23_spill] sm:$0xff] %v2229_v11  ;;  %v588_v30 = vmul.f32 %v2229_v11, %v576_v24  ;;  %v2293_v36 = vld [vmem:[%s3266_s0 + $0xc8] sm:$0xff]  ;;  %3371 = vst [vmem:[#allocation28_spill] sm:$0xff] %v2303_v37 }
  0x29   : > { %v724_v39 = vadd.f32 %v708_v49, %v670_v21  ;;  %v454_v49 = vmul.f32 %v2157_v20, %v1997_v14  ;;  %v1137_v21 = vrot.slane %v2111_v57, 3  ;;  %v416_v12 = vadd.f32 %v400_v16, %v348_v54  ;;  %v2262_v54 = vld [vmem:[%s3266_s0 + $0xf0] sm:$0xff]  ;;  %3370 = vst [vmem:[#allocation27_spill] sm:$0xff] %v2293_v36 }
  0x2a   : > { %3368 = vst [vmem:[#allocation25_spill] sm:$0xff] %v2262_v54 }
  0x2b   : > { %v791_v19 = vadd.f32 %v775_v5, %v724_v39  ;;  %v2255_v5 = vld [vmem:[%s3266_s0 + $0x78] sm:$0xff]  ;;  %v1097_v39 = vmul.f32 %v2215_v63, %v2244_v23  ;;  %v470_v31 = vadd.f32 %v454_v49, %v416_v12  ;;  %v265_v49 = vmul.f32 %v1981_v8, %v2045_v34 }
  0x2c   : > { %3367 = vst [vmem:[#allocation24_spill] sm:$0xff] %v2255_v5  ;;  %v2286_v61 = vsel %vm379_vm2, %v1129_v3, %v1137_v21  ;;  %v655_v51 = vmul.f32 %v2255_v5, %v2276_v29  ;;  %v709_v34 = vmul.f32 %v2268_v28, %v2037_v33  ;;  %v2318_v28 = vsel %vm243_vm0, %v748_v44, %v740_v43 }
  0x2d   : > { %v858_v16 = vadd.f32 %v842_v26, %v791_v19  ;;  %v195_v26 = vmul.f32 %v1994_v13, %v1957_v0  ;;  %v333_v19 = vmul.f32 %v1987_v10, %v2067_v41  ;;  %v537_v55 = vadd.f32 %v521_v9, %v470_v31  ;;  %v2308_v41 = vld [vmem:[%s3266_s0 + $0xa8] sm:$0xff] }
  0x2e   : > { %v1164_v13 = vmul.f32 %v2262_v54, %v2286_v61  ;;  %3372 = vst [vmem:[#allocation29_spill] sm:$0xff] %v2308_v41  ;;  %v401_v31 = vmul.f32 %v2006_v17, %v2089_v48  ;;  %v3373_v54 = vrot.slane %v2034_v32, 2  ;;  %v3374_v5 = vrot.slane %v2037_v33, 2  ;;  %v2331_v48 = vld [vmem:[%s3266_s0 + $0xb8] sm:$0xff] }
  0x2f   : > { %v925_v12 = vadd.f32 %v909_v58, %v858_v16  ;;  %v281_v9 = vadd.f32 %v265_v49, %v195_v26  ;;  %v604_v16 = vadd.f32 %v588_v30, %v537_v55  ;;  %3375 = vst [vmem:[#allocation30_spill] sm:$0xff] %v2331_v48  ;;  %v3376_v55 = vrot.slane %v2034_v32, 3 }
  0x30   : > { %v2326_v26 = vsel %vm311_vm1, %v3374_v5, %v3373_v54  ;;  %v964_v44 = vmul.f32 %v2293_v36, %v2111_v57  ;;  %v455_v5 = vmul.f32 %v2034_v32, %v2019_v22  ;;  %v522_v36 = vmul.f32 %v2027_v27, %v2126_v60 }
  0x31   : > { %v979_v58 = vadd.f32 %v963_v7, %v925_v12  ;;  %v3377_v7 = vrot.slane %v2037_v33, 3  ;;  %v349_v30 = vadd.f32 %v333_v19, %v281_v9  ;;  %v671_v49 = vadd.f32 %v655_v51, %v604_v16  ;;  %v2372_v16 = vld [vmem:[%s3266_s0 + $0xf8] sm:$0xff] }
  0x32   : > { %v776_v12 = vmul.f32 %v2303_v37, %v2318_v28  ;;  %v843_v63 = vmul.f32 %v2308_v41, %v2326_v26  ;;  %v3379_v9 = vrot.slane %v2108_v56, 1  ;;  %v3380_v51 = vrot.slane %v2111_v57, 1  ;;  %3382 = vst [vmem:[#allocation33_spill] sm:$0xff] %v2372_v16 }
  0x33   : > { %v2339_v43 = vsel %vm379_vm2, %v3377_v7, %v3376_v55  ;;  %v1046_v54 = vadd.f32 %v1030_v18, %v979_v58  ;;  %v2352_v55 = vld [vmem:[%s3266_s0 + $0xd8] sm:$0xff]  ;;  %v2367_v58 = vld [vmem:[%s3266_s0 + $0xe8] sm:$0xff]  ;;  %v417_v7 = vadd.f32 %v401_v31, %v349_v30  ;;  %v725_v41 = vadd.f32 %v709_v34, %v671_v49  ;;  %v2393_v34 = vld [vmem:[%s1964_s25 + $0x40] sm:$0xff] }
  0x34   : > { %3378 = vst [vmem:[#allocation31_spill] sm:$0xff] %v2352_v55  ;;  %v910_v19 = vmul.f32 %v2331_v48, %v2339_v43  ;;  %v2362_v18 = vsel %vm243_vm0, %v3380_v51, %v3379_v9  ;;  %3381 = vst [vmem:[#allocation32_spill] sm:$0xff] %v2367_v58  ;;  %v3383_v37 = vrot.slane %v2108_v56, 2  ;;  %v3384_v9 = vrot.slane %v2111_v57, 2 }
  0x35   : > { %v1113_v48 = vadd.f32 %v1097_v39, %v1046_v54  ;;  %v2386_v22 = vsel %vm379_vm2, %v1137_v21, %v1129_v3  ;;  %v1031_v31 = vmul.f32 %v2352_v55, %v2362_v18  ;;  %v471_v30 = vadd.f32 %v455_v5, %v417_v7  ;;  %v2396_v54 = vld [vmem:[%s1964_s25 + $0x48] sm:$0xff] }
  0x36   : > { %v2382_v51 = vsel %vm311_vm1, %v3384_v9, %v3383_v37  ;;  %v589_v39 = vmul.f32 %v2050_v35, %v2165_v25  ;;  %v196_v49 = vmul.f32 %v1997_v14, %v2079_v45  ;;  %v792_v9 = vadd.f32 %v776_v12, %v725_v41 }
  0x37   : > { %v1180_v37 = vadd.f32 %v1164_v13, %v1113_v48  ;;  %v1098_v3 = vmul.f32 %v2367_v58, %v2382_v51  ;;  %v1165_v21 = vmul.f32 %v2372_v16, %v2386_v22  ;;  %v538_v55 = vadd.f32 %v522_v36, %v471_v30 }
  0x38   : > { %v656_v5 = vmul.f32 %v2072_v42, %v2188_v46  ;;  %v266_v7 = vmul.f32 %v2102_v52, %v2224_v6  ;;  %v334_v35 = vmul.f32 %v2118_v59, %v576_v24  ;;  %v859_v14 = vadd.f32 %v843_v63, %v792_v9 }
  0x39   : > { %1196 = vst [vmem:[%s2409_s7] sm:$0xff] %v1180_v37  ;;  %v710_v13 = vmul.f32 %v2108_v56, %v2059_v40  ;;  %v996_v41 = vrot.slane %v2393_v34, 1  ;;  %v1004_v36 = vrot.slane %v2396_v54, 1  ;;  %v605_v48 = vadd.f32 %v589_v39, %v538_v55 }
  0x3a   : > { %v777_v12 = vmul.f32 %v2096_v50, %v2210_v62  ;;  %v282_v30 = vadd.f32 %v266_v7, %v196_v49  ;;  %v402_v6 = vmul.f32 %v2136_v1, %v2276_v29  ;;  %v926_v24 = vadd.f32 %v910_v19, %v859_v14 }
  0x3b   : > { %v844_v37 = vmul.f32 %v2143_v15, %v2244_v23  ;;  %v911_v63 = vmul.f32 %v2170_v2, %v2286_v61  ;;  %v965_v9 = vmul.f32 %v2193_v47, %v2393_v34  ;;  %v672_v16 = vadd.f32 %v656_v5, %v605_v48 }
  0x3c   : > { %v1063_v55 = vrot.slane %v2393_v34, 2  ;;  %v350_v39 = vadd.f32 %v334_v35, %v282_v30  ;;  %v456_v49 = vmul.f32 %v2037_v33, %v2157_v20  ;;  %v980_v7 = vadd.f32 %v964_v44, %v926_v24 }
  0x3d   : > { %v2431_v29 = vsel %vm243_vm0, %v996_v41, %v1004_v36  ;;  %v1071_v19 = vrot.slane %v2396_v54, 2  ;;  %v1130_v14 = vrot.slane %v2393_v34, 3  ;;  %v726_v2 = vadd.f32 %v710_v13, %v672_v16 }
  0x3e   : > { %v1138_v15 = vrot.slane %v2396_v54, 3  ;;  %v418_v47 = vadd.f32 %v402_v6, %v350_v39  ;;  %v523_v5 = vmul.f32 %v2180_v38, %v2318_v28  ;;  %v1047_v35 = vadd.f32 %v1031_v31, %v980_v7 }
  0x3f   : > { %v1032_v48 = vmul.f32 %v2198_v53, %v2431_v29  ;;  %v197_v44 = vmul.f32 %v2034_v32, %v1957_v0  ;;  %v267_v30 = vmul.f32 %v1981_v8, %v2126_v60  ;;  %v793_v24 = vadd.f32 %v777_v12, %v726_v2  ;;  %v3385_v60 = vld [vmem:[#allocation22_spill] sm:$0xff]  ;;  %v3386_v12 = vld [vmem:[#allocation24_spill] sm:$0xff] }
  0x40   : > { %v472_v20 = vadd.f32 %v456_v49, %v418_v47  ;;  %v590_v16 = vmul.f32 %v2229_v11, %v2326_v26  ;;  %v335_v13 = vmul.f32 %v1987_v10, %v2165_v25  ;;  %v1114_v6 = vadd.f32 %v1098_v3, %v1047_v35  ;;  %v3387_v35 = vld [vmem:[#allocation6_spill] sm:$0xff] }
  0x41   : > { %v2450_v31 = vsel %vm311_vm1, %v1063_v55, %v1071_v19  ;;  %v283_v39 = vadd.f32 %v267_v30, %v197_v44  ;;  %v403_v32 = vmul.f32 %v2006_v17, %v2188_v46  ;;  %v860_v7 = vadd.f32 %v844_v37, %v793_v24  ;;  %v3388_v46 = vld [vmem:[#allocation25_spill] sm:$0xff]  ;;  %v3389_v17 = vld [vmem:[#allocation26_spill] sm:$0xff] }
  0x42   : > { %v1099_v2 = vmul.f32 %v3385_v60, %v2450_v31  ;;  %v539_v47 = vadd.f32 %v523_v5, %v472_v20  ;;  %v657_v49 = vmul.f32 %v3386_v12, %v2339_v43  ;;  %v1181_v53 = vadd.f32 %v1165_v21, %v1114_v6  ;;  %v3390_v5 = vld [vmem:[#allocation28_spill] sm:$0xff]  ;;  %v3391_v6 = vld [vmem:[#allocation29_spill] sm:$0xff] }
  0x43   : > { %v2460_v25 = vsel %vm379_vm2, %v1130_v14, %v1138_v15  ;;  %v351_v3 = vadd.f32 %v335_v13, %v283_v39  ;;  %v457_v44 = vmul.f32 %v2108_v56, %v3387_v35  ;;  %v927_v30 = vadd.f32 %v911_v63, %v860_v7 }
  0x44   : > { %v1166_v37 = vmul.f32 %v3388_v46, %v2460_v25  ;;  %v606_v24 = vadd.f32 %v590_v16, %v539_v47  ;;  %v711_v20 = vmul.f32 %v2111_v57, %v3389_v17  ;;  %1197 = vst [vmem:[%s2409_s7 + $0x8] sm:$0x1] %v1181_v53  ;;  %v778_v21 = vmul.f32 %v3390_v5, %v2362_v18  ;;  %v3392_v16 = vld [vmem:[#allocation30_spill] sm:$0xff]  ;;  %v3393_v46 = vld [vmem:[#allocation27_spill] sm:$0xff] }
  0x45   : > { %v845_v60 = vmul.f32 %v3391_v6, %v2382_v51  ;;  %v419_v13 = vadd.f32 %v403_v32, %v351_v3  ;;  %v524_v63 = vmul.f32 %v2027_v27, %v2210_v62  ;;  %v981_v39 = vadd.f32 %v965_v9, %v927_v30  ;;  %v3394_v3 = vld [vmem:[#allocation8_spill] sm:$0xff]  ;;  %v3395_v30 = vld [vmem:[#allocation31_spill] sm:$0xff] }
  0x46   : > { %v673_v7 = vadd.f32 %v657_v49, %v606_v24  ;;  %v912_v47 = vmul.f32 %v3392_v16, %v2386_v22  ;;  %v966_v53 = vmul.f32 %v3393_v46, %v2396_v54  ;;  %v2481_v5 = vsel %vm243_vm0, %v1004_v36, %v996_v41  ;;  %v2496_v16 = vld [vmem:[%s1964_s25 + $0x50] sm:$0xff]  ;;  %v2499_v41 = vld [vmem:[%s1964_s25 + $0x58] sm:$0xff] }
  0x47   : > { %v2485_v6 = vsel %vm311_vm1, %v1071_v19, %v1063_v55  ;;  %v473_v32 = vadd.f32 %v457_v44, %v419_v13  ;;  %v591_v27 = vmul.f32 %v3394_v3, %v2244_v23  ;;  %v1048_v9 = vadd.f32 %v1032_v48, %v981_v39 }
  0x48   : > { %v727_v49 = vadd.f32 %v711_v20, %v673_v7  ;;  %v1033_v24 = vmul.f32 %v3395_v30, %v2481_v5  ;;  %v2493_v46 = vsel %vm379_vm2, %v1138_v15, %v1130_v14  ;;  %v1100_v36 = vmul.f32 %v2367_v58, %v2485_v6 }
  0x49   : > { %v540_v55 = vadd.f32 %v524_v63, %v473_v32  ;;  %v658_v19 = vmul.f32 %v2072_v42, %v2286_v61  ;;  %v198_v48 = vmul.f32 %v2037_v33, %v2079_v45  ;;  %v1115_v44 = vadd.f32 %v1099_v2, %v1048_v9 }
  0x4a   : > { %v794_v20 = vadd.f32 %v778_v21, %v727_v49  ;;  %v712_v15 = vmul.f32 %v2393_v34, %v2059_v40  ;;  %v268_v14 = vmul.f32 %v2102_v52, %v2318_v28  ;;  %v997_v39 = vrot.slane %v2496_v16, 1  ;;  %v3396_v21 = vld [vmem:[#allocation33_spill] sm:$0xff]  ;;  %v3397_v28 = vld [vmem:[#allocation16_spill] sm:$0xff] }
  0x4b   : > { %v607_v13 = vadd.f32 %v591_v27, %v540_v55  ;;  %v1005_v63 = vrot.slane %v2499_v41, 1  ;;  %v336_v7 = vmul.f32 %v2118_v59, %v2326_v26  ;;  %v1182_v32 = vadd.f32 %v1166_v37, %v1115_v44  ;;  %v3398_v26 = vld [vmem:[#allocation18_spill] sm:$0xff] }
  0x4c   : > { %v861_v42 = vadd.f32 %v845_v60, %v794_v20  ;;  %v284_v33 = vadd.f32 %v268_v14, %v198_v48  ;;  %v404_v2 = vmul.f32 %v2136_v1, %v2339_v43  ;;  %v1167_v9 = vmul.f32 %v3396_v21, %v2493_v46  ;;  %v3399_v48 = vld [vmem:[#allocation17_spill] sm:$0xff]  ;;  %v3400_v20 = vld [vmem:[#allocation20_spill] sm:$0xff] }
  0x4d   : > { %v674_v49 = vadd.f32 %v658_v19, %v607_v13  ;;  %v779_v27 = vmul.f32 %v2096_v50, %v2431_v29  ;;  %v846_v55 = vmul.f32 %v3397_v28, %v2450_v31  ;;  %1198 = vst [vmem:[%s2409_s7 + $0x10] sm:$0xff] %v1182_v32  ;;  %v913_v37 = vmul.f32 %v3398_v26, %v2460_v25 }
  0x4e   : > { %v928_v40 = vadd.f32 %v912_v47, %v861_v42  ;;  %v352_v60 = vadd.f32 %v336_v7, %v284_v33  ;;  %v458_v44 = vmul.f32 %v2111_v57, %v3399_v48  ;;  %v967_v14 = vmul.f32 %v3400_v20, %v2496_v16 }
  0x4f   : > { %v728_v43 = vadd.f32 %v712_v15, %v674_v49  ;;  %v1064_v19 = vrot.slane %v2496_v16, 2  ;;  %v1072_v13 = vrot.slane %v2499_v41, 2  ;;  %v2534_v32 = vsel %vm243_vm0, %v997_v39, %v1005_v63 }
  0x50   : > { %v982_v50 = vadd.f32 %v966_v53, %v928_v40  ;;  %v420_v42 = vadd.f32 %v404_v2, %v352_v60  ;;  %v525_v47 = vmul.f32 %v2180_v38, %v2362_v18  ;;  %v1131_v33 = vrot.slane %v2496_v16, 3  ;;  %v3401_v60 = vld [vmem:[#allocation21_spill] sm:$0xff] }
  0x51   : > { %v795_v7 = vadd.f32 %v779_v27, %v728_v43  ;;  %v1139_v15 = vrot.slane %v2499_v41, 3  ;;  %v199_v49 = vmul.f32 %v2108_v56, %v1957_v0  ;;  %v592_v40 = vmul.f32 %v2229_v11, %v2382_v51 }
  0x52   : > { %v1049_v48 = vadd.f32 %v1033_v24, %v982_v50  ;;  %v474_v20 = vadd.f32 %v458_v44, %v420_v42  ;;  %v269_v53 = vmul.f32 %v1981_v8, %v2210_v62  ;;  %v1034_v38 = vmul.f32 %v3401_v60, %v2534_v32  ;;  %v3402_v44 = vld [vmem:[#allocation5_spill] sm:$0xff] }
  0x53   : > { %v862_v2 = vadd.f32 %v846_v55, %v795_v7  ;;  %v659_v27 = vmul.f32 %v3386_v12, %v2386_v22  ;;  %v337_v43 = vmul.f32 %v1987_v10, %v2244_v23  ;;  %v405_v42 = vmul.f32 %v3402_v44, %v2286_v61  ;;  %v3403_v61 = vld [vmem:[#allocation22_spill] sm:$0xff] }
  0x54   : > { %v1116_v56 = vadd.f32 %v1100_v36, %v1049_v48  ;;  %v541_v50 = vadd.f32 %v525_v47, %v474_v20  ;;  %v285_v24 = vadd.f32 %v269_v53, %v199_v49  ;;  %v2556_v62 = vsel %vm311_vm1, %v1064_v19, %v1072_v13  ;;  %v3404_v47 = vld [vmem:[#allocation25_spill] sm:$0xff] }
  0x55   : > { %v929_v11 = vadd.f32 %v913_v37, %v862_v2  ;;  %v2560_v55 = vsel %vm379_vm2, %v1131_v33, %v1139_v15  ;;  %v713_v7 = vmul.f32 %v2396_v54, %v3389_v17  ;;  %v459_v48 = vmul.f32 %v2393_v34, %v3387_v35  ;;  %v3405_v2 = vld [vmem:[#allocation28_spill] sm:$0xff] }
  0x56   : > { %v1183_v23 = vadd.f32 %v1167_v9, %v1116_v56  ;;  %v608_v12 = vadd.f32 %v592_v40, %v541_v50  ;;  %v353_v36 = vadd.f32 %v337_v43, %v285_v24  ;;  %v1101_v37 = vmul.f32 %v3403_v61, %v2556_v62  ;;  %v3406_v9 = vld [vmem:[#allocation7_spill] sm:$0xff]  ;;  %v3407_v56 = vld [vmem:[#allocation29_spill] sm:$0xff] }
  0x57   : > { %v983_v20 = vadd.f32 %v967_v14, %v929_v11  ;;  %v1168_v49 = vmul.f32 %v3404_v47, %v2560_v55  ;;  %v780_v44 = vmul.f32 %v3405_v2, %v2481_v5  ;;  %v526_v40 = vmul.f32 %v3406_v9, %v2431_v29  ;;  %v3408_v14 = vld [vmem:[#allocation30_spill] sm:$0xff]  ;;  %v3409_v24 = vld [vmem:[#allocation27_spill] sm:$0xff] }
  0x58   : > { %1199 = vst [vmem:[%s2409_s7 + $0x18] sm:$0x1] %v1183_v23  ;;  %v675_v53 = vadd.f32 %v659_v27, %v608_v12  ;;  %v421_v60 = vadd.f32 %v405_v42, %v353_v36  ;;  %v847_v11 = vmul.f32 %v3407_v56, %v2485_v6  ;;  %v914_v50 = vmul.f32 %v3408_v14, %v2493_v46 }
  0x59   : > { %v1050_v43 = vadd.f32 %v1034_v38, %v983_v20  ;;  %v968_v23 = vmul.f32 %v3409_v24, %v2499_v41  ;;  %v2583_v27 = vsel %vm243_vm0, %v1005_v63, %v997_v39  ;;  %v593_v38 = vmul.f32 %v3394_v3, %v2450_v31 }
  0x5a   : > { %v729_v12 = vadd.f32 %v713_v7, %v675_v53  ;;  %v475_v42 = vadd.f32 %v459_v48, %v421_v60  ;;  %v1035_v20 = vmul.f32 %v3395_v30, %v2583_v27  ;;  %v2591_v9 = vsel %vm311_vm1, %v1072_v13, %v1064_v19  ;;  %v3410_v60 = vld [vmem:[#allocation10_spill] sm:$0xff] }
  0x5b   : > { %v1117_v36 = vadd.f32 %v1101_v37, %v1050_v43  ;;  %v200_v7 = vmul.f32 %v2111_v57, %v2079_v45  ;;  %v1102_v39 = vmul.f32 %v2367_v58, %v2591_v9  ;;  %v660_v48 = vmul.f32 %v3410_v60, %v2460_v25  ;;  %v2600_v37 = vld [vmem:[%s1964_s25 + $0x60] sm:$0xff]  ;;  %v2603_v43 = vld [vmem:[%s1964_s25 + $0x68] sm:$0xff] }
  0x5c   : > { %v796_v53 = vadd.f32 %v780_v44, %v729_v12  ;;  %v542_v63 = vadd.f32 %v526_v40, %v475_v42  ;;  %v2607_v19 = vsel %vm379_vm2, %v1139_v15, %v1131_v33  ;;  %v270_v57 = vmul.f32 %v2102_v52, %v2362_v18  ;;  %v3411_v42 = vld [vmem:[#allocation9_spill] sm:$0xff] }
  0x5d   : > { %v1184_v3 = vadd.f32 %v1168_v49, %v1117_v36  ;;  %v338_v13 = vmul.f32 %v2118_v59, %v2382_v51  ;;  %v1169_v40 = vmul.f32 %v3396_v21, %v2607_v19  ;;  %v714_v60 = vmul.f32 %v2496_v16, %v3411_v42  ;;  %v3412_v51 = vld [vmem:[#allocation12_spill] sm:$0xff]  ;;  %v3414_v42 = vld [vmem:[#allocation17_spill] sm:$0xff] }
  0x5e   : > { %v863_v44 = vadd.f32 %v847_v11, %v796_v53  ;;  %v609_v12 = vadd.f32 %v593_v38, %v542_v63  ;;  %v998_v49 = vrot.slane %v2600_v37, 1  ;;  %v1006_v33 = vrot.slane %v2603_v43, 1 }
  0x5f   : > { %1200 = vst [vmem:[%s2409_s7 + $0x20] sm:$0xff] %v1184_v3  ;;  %v286_v15 = vadd.f32 %v270_v57, %v200_v7  ;;  %v406_v18 = vmul.f32 %v2136_v1, %v2386_v22  ;;  %v781_v11 = vmul.f32 %v3412_v51, %v2534_v32  ;;  %v848_v38 = vmul.f32 %v3397_v28, %v2556_v62  ;;  %v3413_v3 = vld [vmem:[#allocation20_spill] sm:$0xff]  ;;  %v3415_v28 = vld [vmem:[#allocation19_spill] sm:$0xff] }
  0x60   : > { %v930_v36 = vadd.f32 %v914_v50, %v863_v44  ;;  %v676_v52 = vadd.f32 %v660_v48, %v609_v12  ;;  %v915_v53 = vmul.f32 %v3398_v26, %v2560_v55  ;;  %v969_v63 = vmul.f32 %v3413_v3, %v2600_v37 }
  0x61   : > { %v354_v59 = vadd.f32 %v338_v13, %v286_v15  ;;  %v460_v7 = vmul.f32 %v2396_v54, %v3414_v42  ;;  %v1065_v50 = vrot.slane %v2600_v37, 2  ;;  %v1073_v48 = vrot.slane %v2603_v43, 2 }
  0x62   : > { %v984_v57 = vadd.f32 %v968_v23, %v930_v36  ;;  %v730_v22 = vadd.f32 %v714_v60, %v676_v52  ;;  %v2636_v44 = vsel %vm243_vm0, %v998_v49, %v1006_v33  ;;  %v1132_v12 = vrot.slane %v2600_v37, 3  ;;  %v3416_v60 = vld [vmem:[#allocation23_spill] sm:$0xff] }
  0x63   : > { %v422_v26 = vadd.f32 %v406_v18, %v354_v59  ;;  %v527_v3 = vmul.f32 %v3415_v28, %v2481_v5  ;;  %v1140_v42 = vrot.slane %v2603_v43, 3  ;;  %v201_v52 = vmul.f32 %v2393_v34, %v1957_v0 }
  0x64   : > { %v1051_v13 = vadd.f32 %v1035_v20, %v984_v57  ;;  %v797_v15 = vadd.f32 %v781_v11, %v730_v22  ;;  %v594_v36 = vmul.f32 %v3416_v60, %v2485_v6  ;;  %v271_v51 = vmul.f32 %v1981_v8, %v2431_v29  ;;  %v3417_v20 = vld [vmem:[#allocation21_spill] sm:$0xff] }
  0x65   : > { %v476_v23 = vadd.f32 %v460_v7, %v422_v26  ;;  %v339_v59 = vmul.f32 %v1987_v10, %v2450_v31  ;;  %v1036_v11 = vmul.f32 %v3417_v20, %v2636_v44  ;;  %v2654_v57 = vsel %vm311_vm1, %v1065_v50, %v1073_v48  ;;  %v3418_v26 = vld [vmem:[#allocation24_spill] sm:$0xff]  ;;  %v3419_v29 = vld [vmem:[#allocation5_spill] sm:$0xff] }
  0x66   : > { %v1118_v18 = vadd.f32 %v1102_v39, %v1051_v13  ;;  %v864_v28 = vadd.f32 %v848_v38, %v797_v15  ;;  %v661_v7 = vmul.f32 %v3418_v26, %v2493_v46  ;;  %v287_v22 = vadd.f32 %v271_v51, %v201_v52 }
  0x67   : > { %v543_v34 = vadd.f32 %v527_v3, %v476_v23  ;;  %v407_v60 = vmul.f32 %v3419_v29, %v2460_v25  ;;  %v1103_v39 = vmul.f32 %v3403_v61, %v2654_v57  ;;  %v2664_v38 = vsel %vm379_vm2, %v1132_v12, %v1140_v42 }
  0x68   : > { %v1185_v8 = vadd.f32 %v1169_v40, %v1118_v18  ;;  %v931_v31 = vadd.f32 %v915_v53, %v864_v28  ;;  %v715_v3 = vmul.f32 %v2499_v41, %v3389_v17  ;;  %v355_v15 = vadd.f32 %v339_v59, %v287_v22  ;;  %v3420_v59 = vld [vmem:[#allocation7_spill] sm:$0xff] }
  0x69   : > { %v610_v13 = vadd.f32 %v594_v36, %v543_v34  ;;  %v461_v51 = vmul.f32 %v2496_v16, %v3387_v35  ;;  %v1170_v25 = vmul.f32 %v3404_v47, %v2664_v38  ;;  %v782_v28 = vmul.f32 %v3405_v2, %v2583_v27 }
  0x6a   : > { %1201 = vst [vmem:[%s2409_s7 + $0x28] sm:$0x1] %v1185_v8  ;;  %v985_v52 = vadd.f32 %v969_v63, %v931_v31  ;;  %v849_v40 = vmul.f32 %v3407_v56, %v2591_v9  ;;  %v916_v23 = vmul.f32 %v3408_v14, %v2607_v19  ;;  %v423_v36 = vadd.f32 %v407_v60, %v355_v15 }
  0x6b   : > { %v677_v53 = vadd.f32 %v661_v7, %v610_v13  ;;  %v528_v18 = vmul.f32 %v3420_v59, %v2534_v32  ;;  %v970_v63 = vmul.f32 %v3409_v24, %v2603_v43  ;;  %v2685_v34 = vsel %vm243_vm0, %v1006_v33, %v998_v49  ;;  %v3421_v13 = vld [vmem:[#allocation8_spill] sm:$0xff] }
  0x6c   : > { %v1052_v8 = vadd.f32 %v1036_v11, %v985_v52  ;;  %v2689_v7 = vsel %vm311_vm1, %v1073_v48, %v1065_v50  ;;  %v1037_v60 = vmul.f32 %v3395_v30, %v2685_v34  ;;  %v477_v31 = vadd.f32 %v461_v51, %v423_v36  ;;  %v2709_v36 = vld [vmem:[%s1964_s25 + $0x78] sm:$0xff] }
  0x6d   : > { %v731_v22 = vadd.f32 %v715_v3, %v677_v53  ;;  %v595_v11 = vmul.f32 %v3421_v13, %v2556_v62  ;;  %v1104_v52 = vmul.f32 %v2367_v58, %v2689_v7  ;;  %v2699_v49 = vsel %vm379_vm2, %v1140_v42, %v1132_v12  ;;  %v3422_v3 = vld [vmem:[#allocation10_spill] sm:$0xff]  ;;  %v2706_v53 = vld [vmem:[%s1964_s25 + $0x70] sm:$0xff] }
  0x6e   : > { %v1119_v15 = vadd.f32 %v1103_v39, %v1052_v8  ;;  %v202_v33 = vmul.f32 %v2396_v54, %v2079_v45  ;;  %v544_v48 = vadd.f32 %v528_v18, %v477_v31  ;;  %v662_v51 = vmul.f32 %v3422_v3, %v2560_v55  ;;  %v3423_v39 = vld [vmem:[#allocation13_spill] sm:$0xff]  ;;  %v3425_v54 = vld [vmem:[#allocation14_spill] sm:$0xff]  ;;  %v3426_v3 = vld [vmem:[#allocation12_spill] sm:$0xff] }
  0x6f   : > { %v798_v50 = vadd.f32 %v782_v28, %v731_v22  ;;  %v272_v8 = vmul.f32 %v3423_v39, %v2481_v5  ;;  %v1171_v42 = vmul.f32 %v3396_v21, %v2699_v49  ;;  %v3424_v12 = vld [vmem:[#allocation9_spill] sm:$0xff]  ;;  %v340_v28 = vmul.f32 %v3425_v54, %v2485_v6 }
  0x70   : > { %v1186_v58 = vadd.f32 %v1170_v25, %v1119_v15  ;;  %v716_v30 = vmul.f32 %v2600_v37, %v3424_v12  ;;  %v611_v22 = vadd.f32 %v595_v11, %v544_v48  ;;  %v408_v45 = vmul.f32 %v2136_v1, %v2493_v46  ;;  %v3427_v25 = vld [vmem:[#allocation16_spill] sm:$0xff] }
  0x71   : > { %v865_v18 = vadd.f32 %v849_v40, %v798_v50  ;;  %v288_v31 = vadd.f32 %v272_v8, %v202_v33  ;;  %v783_v5 = vmul.f32 %v3426_v3, %v2636_v44  ;;  %v850_v15 = vmul.f32 %v3427_v25, %v2654_v57  ;;  %v3428_v40 = vld [vmem:[#allocation17_spill] sm:$0xff]  ;;  %v3429_v33 = vld [vmem:[#allocation18_spill] sm:$0xff] }
  0x72   : > { %1202 = vst [vmem:[%s2409_s7 + $0x30] sm:$0xff] %v1186_v58  ;;  %v999_v21 = vrot.slane %v2706_v53, 1  ;;  %v1007_v39 = vrot.slane %v2709_v36, 1  ;;  %v678_v24 = vadd.f32 %v662_v51, %v611_v22  ;;  %v462_v11 = vmul.f32 %v2499_v41, %v3428_v40  ;;  %v3430_v58 = vld [vmem:[#allocation20_spill] sm:$0xff] }
  0x73   : > { %v932_v12 = vadd.f32 %v916_v23, %v865_v18  ;;  %v356_v6 = vadd.f32 %v340_v28, %v288_v31  ;;  %v917_v46 = vmul.f32 %v3429_v33, %v2664_v38  ;;  %v971_v50 = vmul.f32 %v3430_v58, %v2706_v53  ;;  %v3431_v23 = vld [vmem:[#allocation19_spill] sm:$0xff]  ;;  %v3432_v31 = vld [vmem:[#allocation4_spill] sm:$0xff] }
  0x74   : > { %v1066_v48 = vrot.slane %v2706_v53, 2  ;;  %v1074_v8 = vrot.slane %v2709_v36, 2  ;;  %v732_v1 = vadd.f32 %v716_v30, %v678_v24  ;;  %v529_v51 = vmul.f32 %v3431_v23, %v2583_v27 }
  0x75   : > { %v986_v25 = vadd.f32 %v970_v63, %v932_v12  ;;  %v424_v3 = vadd.f32 %v408_v45, %v356_v6  ;;  %v2740_v28 = vsel %vm243_vm0, %v999_v21, %v1007_v39  ;;  %v1133_v18 = vrot.slane %v2706_v53, 3  ;;  %v3433_v45 = vld [vmem:[#allocation23_spill] sm:$0xff] }
  0x76   : > { %v203_v22 = vmul.f32 %v2496_v16, %v1957_v0  ;;  %v273_v58 = vmul.f32 %v3432_v31, %v2534_v32  ;;  %v799_v33 = vadd.f32 %v783_v5, %v732_v1  ;;  %v596_v30 = vmul.f32 %v3433_v45, %v2591_v9 }
  0x77   : > { %v1053_v40 = vadd.f32 %v1037_v60, %v986_v25  ;;  %v478_v63 = vadd.f32 %v462_v11, %v424_v3  ;;  %v1141_v24 = vrot.slane %v2709_v36, 3  ;;  %v341_v6 = vmul.f32 %v1987_v10, %v2556_v62 }
  0x78   : > { %v289_v12 = vadd.f32 %v273_v58, %v203_v22  ;;  %v409_v23 = vmul.f32 %v3419_v29, %v2560_v55  ;;  %v866_v16 = vadd.f32 %v850_v15, %v799_v33  ;;  %v663_v1 = vmul.f32 %v3418_v26, %v2607_v19 }
  0x79   : > { %v1120_v54 = vadd.f32 %v1104_v52, %v1053_v40  ;;  %v545_v0 = vadd.f32 %v529_v51, %v478_v63  ;;  %v1038_v32 = vmul.f32 %v3417_v20, %v2740_v28  ;;  %v2760_v60 = vsel %vm311_vm1, %v1066_v48, %v1074_v8 }
  0x7a   : > { %v357_v3 = vadd.f32 %v341_v6, %v289_v12  ;;  %v463_v62 = vmul.f32 %v2600_v37, %v3387_v35  ;;  %v933_v55 = vadd.f32 %v917_v46, %v866_v16  ;;  %v717_v25 = vmul.f32 %v2603_v43, %v3389_v17 }
  0x7b   : > { %v1187_v5 = vadd.f32 %v1171_v42, %v1120_v54  ;;  %v612_v52 = vadd.f32 %v596_v30, %v545_v0  ;;  %v1105_v15 = vmul.f32 %v3403_v61, %v2760_v60  ;;  %v2770_v40 = vsel %vm379_vm2, %v1133_v18, %v1141_v24  ;;  %v3434_v30 = vld [vmem:[#allocation27_spill] sm:$0xff] }
  0x7c   : > { %v425_v11 = vadd.f32 %v409_v23, %v357_v3  ;;  %v530_v33 = vmul.f32 %v3420_v59, %v2636_v44  ;;  %v987_v58 = vadd.f32 %v971_v50, %v933_v55  ;;  %v1172_v42 = vmul.f32 %v3404_v47, %v2770_v40  ;;  %v3435_v3 = vld [vmem:[#allocation10_spill] sm:$0xff] }
  0x7d   : > { %1203 = vst [vmem:[%s2409_s7 + $0x38] sm:$0x1] %v1187_v5  ;;  %v679_v0 = vadd.f32 %v663_v1, %v612_v52  ;;  %v784_v54 = vmul.f32 %v3405_v2, %v2685_v34  ;;  %v851_v46 = vmul.f32 %v3407_v56, %v2689_v7  ;;  %v918_v51 = vmul.f32 %v3408_v14, %v2699_v49  ;;  %v3436_v5 = vld [vmem:[#allocation11_spill] sm:$0xff] }
  0x7e   : > { %v479_v22 = vadd.f32 %v463_v62, %v425_v11  ;;  %v597_v23 = vmul.f32 %v3421_v13, %v2654_v57  ;;  %v1054_v50 = vadd.f32 %v1038_v32, %v987_v58  ;;  %v972_v12 = vmul.f32 %v3434_v30, %v2709_v36  ;;  %v2811_v58 = vld [vmem:[%s1964_s25 + $0x88] sm:$0xff] }
  0x7f   : > { %v733_v63 = vadd.f32 %v717_v25, %v679_v0  ;;  %v2789_v6 = vsel %vm243_vm0, %v1007_v39, %v999_v21  ;;  %v2793_v16 = vsel %vm311_vm1, %v1074_v8, %v1066_v48  ;;  %v664_v62 = vmul.f32 %v3435_v3, %v2664_v38  ;;  %v3437_v25 = vld [vmem:[#allocation31_spill] sm:$0xff]  ;;  %v3438_v48 = vld [vmem:[#allocation9_spill] sm:$0xff]  ;;  %v3440_v0 = vld [vmem:[#allocation14_spill] sm:$0xff] }
  0x80   : > { %v546_v1 = vadd.f32 %v530_v33, %v479_v22  ;;  %v204_v55 = vmul.f32 %v2499_v41, %v3436_v5  ;;  %v1121_v32 = vadd.f32 %v1105_v15, %v1054_v50  ;;  %v1039_v11 = vmul.f32 %v3437_v25, %v2789_v6  ;;  %v2808_v33 = vld [vmem:[%s1964_s25 + $0x80] sm:$0xff]  ;;  %v3439_v41 = vld [vmem:[#allocation13_spill] sm:$0xff]  ;;  %v3443_v25 = vld [vmem:[#allocation12_spill] sm:$0xff] }
  0x81   : > { %v800_v52 = vadd.f32 %v784_v54, %v733_v63  ;;  %v2803_v21 = vsel %vm379_vm2, %v1141_v24, %v1133_v18  ;;  %v718_v8 = vmul.f32 %v2706_v53, %v3438_v48  ;;  %v274_v15 = vmul.f32 %v3439_v41, %v2583_v27  ;;  %v3441_v63 = vld [vmem:[#allocation32_spill] sm:$0xff]  ;;  %v3442_v24 = vld [vmem:[#allocation33_spill] sm:$0xff]  ;;  %v3444_v3 = vld [vmem:[#allocation15_spill] sm:$0xff] }
  0x82   : > { %v613_v39 = vadd.f32 %v597_v23, %v546_v1  ;;  %v342_v54 = vmul.f32 %v3440_v0, %v2591_v9  ;;  %v1188_v22 = vadd.f32 %v1172_v42, %v1121_v32  ;;  %v1106_v18 = vmul.f32 %v3441_v63, %v2793_v16  ;;  %v3445_v9 = vld [vmem:[#allocation16_spill] sm:$0xff]  ;;  %v3447_v63 = vld [vmem:[#allocation17_spill] sm:$0xff] }
  0x83   : > { %v867_v50 = vadd.f32 %v851_v46, %v800_v52  ;;  %v1173_v23 = vmul.f32 %v3442_v24, %v2803_v21  ;;  %v785_v48 = vmul.f32 %v3443_v25, %v2740_v28  ;;  %v290_v5 = vadd.f32 %v274_v15, %v204_v55  ;;  %v3446_v24 = vld [vmem:[#allocation18_spill] sm:$0xff] }
  0x84   : > { %v680_v1 = vadd.f32 %v664_v62, %v613_v39  ;;  %v410_v30 = vmul.f32 %v3444_v3, %v2607_v19  ;;  %1204 = vst [vmem:[%s2409_s7 + $0x40] sm:$0xff] %v1188_v22  ;;  %v852_v42 = vmul.f32 %v3445_v9, %v2760_v60  ;;  %v1000_v46 = vrot.slane %v2808_v33, 1  ;;  %v3448_v19 = vld [vmem:[#allocation20_spill] sm:$0xff] }
  0x85   : > { %v934_v27 = vadd.f32 %v918_v51, %v867_v50  ;;  %v1008_v32 = vrot.slane %v2811_v58, 1  ;;  %v919_v62 = vmul.f32 %v3446_v24, %v2770_v40  ;;  %v358_v39 = vadd.f32 %v342_v54, %v290_v5 }
  0x86   : > { %v734_v52 = vadd.f32 %v718_v8, %v680_v1  ;;  %v464_v55 = vmul.f32 %v2603_v43, %v3447_v63  ;;  %v973_v22 = vmul.f32 %v3448_v19, %v2808_v33  ;;  %v1067_v51 = vrot.slane %v2808_v33, 2  ;;  %v3449_v8 = vld [vmem:[#allocation19_spill] sm:$0xff] }
  0x87   : > { %v988_v15 = vadd.f32 %v972_v12, %v934_v27  ;;  %v1075_v50 = vrot.slane %v2811_v58, 2  ;;  %v1134_v3 = vrot.slane %v2808_v33, 3  ;;  %v426_v25 = vadd.f32 %v410_v30, %v358_v39  ;;  %v3450_v12 = vld [vmem:[#allocation3_spill] sm:$0xff] }
  0x88   : > { %v801_v9 = vadd.f32 %v785_v48, %v734_v52  ;;  %v531_v1 = vmul.f32 %v3449_v8, %v2685_v34  ;;  %v2843_v5 = vsel %vm243_vm0, %v1000_v46, %v1008_v32  ;;  %v205_v54 = vmul.f32 %v2600_v37, %v3450_v12 }
  0x89   : > { %v1055_v24 = vadd.f32 %v1039_v11, %v988_v15  ;;  %v275_v27 = vmul.f32 %v3432_v31, %v2636_v44  ;;  %v480_v19 = vadd.f32 %v464_v55, %v426_v25  ;;  %v598_v48 = vmul.f32 %v3433_v45, %v2689_v7 }
  0x8a   : > { %v868_v63 = vadd.f32 %v852_v42, %v801_v9  ;;  %v343_v30 = vmul.f32 %v1987_v10, %v2654_v57  ;;  %v1142_v11 = vrot.slane %v2811_v58, 3  ;;  %v411_v15 = vmul.f32 %v3419_v29, %v2664_v38 }
  0x8b   : > { %v1122_v52 = vadd.f32 %v1106_v18, %v1055_v24  ;;  %v291_v39 = vadd.f32 %v275_v27, %v205_v54  ;;  %v1040_v44 = vmul.f32 %v3417_v20, %v2843_v5  ;;  %v547_v31 = vadd.f32 %v531_v1, %v480_v19 }
  0x8c   : > { %v935_v37 = vadd.f32 %v919_v62, %v868_v63  ;;  %v665_v25 = vmul.f32 %v3418_v26, %v2699_v49  ;;  %v2862_v10 = vsel %vm311_vm1, %v1067_v51, %v1075_v50  ;;  %v465_v18 = vmul.f32 %v2706_v53, %v3387_v35 }
  0x8d   : > { %v1189_v9 = vadd.f32 %v1173_v23, %v1122_v52  ;;  %v359_v57 = vadd.f32 %v343_v30, %v291_v39  ;;  %v1107_v29 = vmul.f32 %v3403_v61, %v2862_v10  ;;  %v614_v38 = vadd.f32 %v598_v48, %v547_v31  ;;  %v3451_v30 = vld [vmem:[#allocation27_spill] sm:$0xff] }
  0x8e   : > { %v989_v24 = vadd.f32 %v973_v22, %v935_v37  ;;  %v719_v63 = vmul.f32 %v2709_v36, %v3389_v17  ;;  %v2873_v23 = vsel %vm379_vm2, %v1134_v3, %v1142_v11  ;;  %v532_v62 = vmul.f32 %v3420_v59, %v2740_v28  ;;  %v3452_v37 = vld [vmem:[#allocation10_spill] sm:$0xff]  ;;  %v3453_v31 = vld [vmem:[#allocation11_spill] sm:$0xff] }
  0x8f   : > { %1205 = vst [vmem:[%s2409_s7 + $0x48] sm:$0x1] %v1189_v9  ;;  %v427_v42 = vadd.f32 %v411_v15, %v359_v57  ;;  %v1174_v35 = vmul.f32 %v3404_v47, %v2873_v23  ;;  %v681_v19 = vadd.f32 %v665_v25, %v614_v38  ;;  %v786_v22 = vmul.f32 %v3405_v2, %v2789_v6 }
  0x90   : > { %v1056_v55 = vadd.f32 %v1040_v44, %v989_v24  ;;  %v853_v1 = vmul.f32 %v3407_v56, %v2793_v16  ;;  %v599_v54 = vmul.f32 %v3421_v13, %v2760_v60  ;;  %v920_v59 = vmul.f32 %v3408_v14, %v2803_v21 }
  0x91   : > { %v481_v12 = vadd.f32 %v465_v18, %v427_v42  ;;  %v735_v48 = vadd.f32 %v719_v63, %v681_v19  ;;  %v974_v52 = vmul.f32 %v3451_v30, %v2811_v58  ;;  %v2891_v39 = vsel %vm243_vm0, %v1008_v32, %v1000_v46  ;;  %v3454_v32 = vld [vmem:[#allocation9_spill] sm:$0xff]  ;;  %v3455_v63 = vld [vmem:[#allocation31_spill] sm:$0xff] }
  0x92   : > { %v1123_v27 = vadd.f32 %v1107_v29, %v1056_v55  ;;  %v666_v44 = vmul.f32 %v3452_v37, %v2770_v40  ;;  %v206_v13 = vmul.f32 %v2603_v43, %v3453_v31  ;;  %v2899_v57 = vsel %vm311_vm1, %v1075_v50, %v1067_v51  ;;  %v3456_v50 = vld [vmem:[#allocation32_spill] sm:$0xff] }
  0x93   : > { %v548_v15 = vadd.f32 %v532_v62, %v481_v12  ;;  %v802_v9 = vadd.f32 %v786_v22, %v735_v48  ;;  %v2903_v18 = vsel %vm379_vm2, %v1142_v11, %v1134_v3  ;;  %v720_v24 = vmul.f32 %v2808_v33, %v3454_v32  ;;  %v3457_v3 = vld [vmem:[#allocation33_spill] sm:$0xff]  ;;  %v3462_v48 = vld [vmem:[#allocation20_spill] sm:$0xff] }
  0x94   : > { %v1190_v25 = vadd.f32 %v1174_v35, %v1123_v27  ;;  %v276_v29 = vmul.f32 %v3439_v41, %v2685_v34  ;;  %v344_v43 = vmul.f32 %v3440_v0, %v2689_v7  ;;  %v1041_v51 = vmul.f32 %v3455_v63, %v2891_v39  ;;  %v2919_v62 = vld [vmem:[%s1964_s25 + $0x90] sm:$0xff]  ;;  %v3458_v35 = vld [vmem:[#allocation12_spill] sm:$0xff]  ;;  %v2924_v41 = vld [vmem:[%s1964_s25 + $0x98] sm:$0xff] }
  0x95   : > { %v615_v46 = vadd.f32 %v599_v54, %v548_v15  ;;  %v869_v38 = vadd.f32 %v853_v1, %v802_v9  ;;  %v1108_v42 = vmul.f32 %v3456_v50, %v2899_v57  ;;  %v1175_v11 = vmul.f32 %v3457_v3, %v2903_v18  ;;  %v3459_v0 = vld [vmem:[#allocation15_spill] sm:$0xff]  ;;  %v3460_v1 = vld [vmem:[#allocation16_spill] sm:$0xff]  ;;  %v3461_v54 = vld [vmem:[#allocation18_spill] sm:$0xff] }
  0x96   : > { %1206 = vst [vmem:[%s2409_s7 + $0x50] sm:$0xff] %v1190_v25  ;;  %v787_v34 = vmul.f32 %v3458_v35, %v2843_v5  ;;  %v292_v7 = vadd.f32 %v276_v29, %v206_v13  ;;  %v412_v19 = vmul.f32 %v3459_v0, %v2699_v49  ;;  %v854_v12 = vmul.f32 %v3460_v1, %v2862_v10  ;;  %v3463_v25 = vld [vmem:[#allocation17_spill] sm:$0xff] }
  0x97   : > { %v682_v55 = vadd.f32 %v666_v44, %v615_v46  ;;  %v936_v22 = vadd.f32 %v920_v59, %v869_v38  ;;  %v921_v27 = vmul.f32 %v3461_v54, %v2873_v23  ;;  %v975_v15 = vmul.f32 %v3462_v48, %v2919_v62  ;;  %v1760_v35 = vld [vmem:[%s3266_s0 + $0x10] sm:$0xff] }
  0x98   : > { %v1001_v44 = vrot.slane %v2919_v62, 1  ;;  %v360_v31 = vadd.f32 %v344_v43, %v292_v7  ;;  %v466_v13 = vmul.f32 %v2709_v36, %v3463_v25  ;;  %v1009_v49 = vrot.slane %v2924_v41, 1  ;;  %v1759_v43 = vld [vmem:[%s3266_s0] sm:$0xff] }
  0x99   : > { %v736_v37 = vadd.f32 %v720_v24, %v682_v55  ;;  %v990_v9 = vadd.f32 %v974_v52, %v936_v22  ;;  %v1068_v59 = vrot.slane %v2919_v62, 2  ;;  %v1076_v46 = vrot.slane %v2924_v41, 2 }
  0x9a   : > { %v1135_v29 = vrot.slane %v2919_v62, 3  ;;  %v428_v38 = vadd.f32 %v412_v19, %v360_v31  ;;  %v533_v24 = vmul.f32 %v3449_v8, %v2789_v6  ;;  %v207_v52 = vmul.f32 %v1759_v43, %v2706_v53  ;;  %v1765_v43 = vld [vmem:[%s3266_s0 + $0x60] sm:$0xff] }
  0x9b   : > { %v803_v32 = vadd.f32 %v787_v34, %v736_v37  ;;  %v1057_v55 = vadd.f32 %v1041_v51, %v990_v9  ;;  %v277_v7 = vmul.f32 %v1760_v35, %v2740_v28  ;;  %v1761_v34 = vld [vmem:[%s3266_s0 + $0x20] sm:$0xff]  ;;  %v1143_v51 = vrot.slane %v2924_v41, 3  ;;  %v1766_v35 = vld [vmem:[%s3266_s0 + $0x8] sm:$0xff] }
  0x9c   : > { %v345_v0 = vmul.f32 %v1761_v34, %v2760_v60  ;;  %v482_v19 = vadd.f32 %v466_v13, %v428_v38  ;;  %v600_v22 = vmul.f32 %v3433_v45, %v2793_v16  ;;  %v1017_v28 = vsel %vm243_vm0, %v1001_v44, %v1009_v49  ;;  %v1762_v60 = vld [vmem:[%s3266_s0 + $0x30] sm:$0xff] }
  0x9d   : > { %v870_v8 = vadd.f32 %v854_v12, %v803_v32  ;;  %v1124_v53 = vadd.f32 %v1108_v42, %v1057_v55  ;;  %v293_v1 = vadd.f32 %v277_v7, %v207_v52  ;;  %v413_v12 = vmul.f32 %v1762_v60, %v2770_v40  ;;  %v1763_v40 = vld [vmem:[%s3266_s0 + $0x40] sm:$0xff] }
  0x9e   : > { %v1042_v48 = vmul.f32 %v3417_v20, %v1017_v28  ;;  %v549_v45 = vadd.f32 %v533_v24, %v482_v19  ;;  %v667_v42 = vmul.f32 %v3418_v26, %v2803_v21  ;;  %v1084_v31 = vsel %vm311_vm1, %v1068_v59, %v1076_v46 }
  0x9f   : > { %v937_v54 = vadd.f32 %v921_v27, %v870_v8  ;;  %v1191_v37 = vadd.f32 %v1175_v11, %v1124_v53  ;;  %v361_v25 = vadd.f32 %v345_v0, %v293_v1  ;;  %v467_v27 = vmul.f32 %v1763_v40, %v2808_v33  ;;  %v1764_v33 = vld [vmem:[%s3266_s0 + $0x50] sm:$0xff] }
  0xa0   : > { %v1109_v13 = vmul.f32 %v3403_v61, %v1084_v31  ;;  %v616_v9 = vadd.f32 %v600_v22, %v549_v45  ;;  %v721_v26 = vmul.f32 %v2811_v58, %v3389_v17  ;;  %v2991_v11 = vsel %vm379_vm2, %v1135_v29, %v1143_v51  ;;  %v1767_v8 = vld [vmem:[%s3266_s0 + $0x70] sm:$0xff] }
  0xa1   : > { %v991_v20 = vadd.f32 %v975_v15, %v937_v54  ;;  %1207 = vst [vmem:[%s2409_s7 + $0x58] sm:$0x1] %v1191_v37  ;;  %v429_v32 = vadd.f32 %v413_v12, %v361_v25  ;;  %v534_v61 = vmul.f32 %v1764_v33, %v2843_v5  ;;  %v1176_v17 = vmul.f32 %v3404_v47, %v2991_v11  ;;  %v3040_v12 = vld [vmem:[%s1964_s25 + $0xa0] sm:$0xff]  ;;  %v3043_v54 = vld [vmem:[%s1964_s25 + $0xa8] sm:$0xff]  ;;  %s1627_s25 = sshll.u32 (%p1942_p3), %s1853_s11, 3 }
  0xa2   : > { %v683_v38 = vadd.f32 %v667_v42, %v616_v9  ;;  %v788_v24 = vmul.f32 %v3405_v2, %v2891_v39  ;;  %v601_v52 = vmul.f32 %v1765_v43, %v2862_v10  ;;  %v208_v5 = vmul.f32 %v1766_v35, %v2709_v36  ;;  %s1220_s28 = ssub.s32 (%p1942_p3), 9, %s1627_s25 }
  0xa3   : > { %v1058_v15 = vadd.f32 %v1042_v48, %v991_v20  ;;  %v483_v55 = vadd.f32 %v467_v27, %v429_v32  ;;  %v855_v47 = vmul.f32 %v3407_v56, %v2899_v57  ;;  %v922_v2 = vmul.f32 %v3408_v14, %v2903_v18  ;;  %v1768_v56 = vld [vmem:[%s3266_s0 + $0x18] sm:$0xff]  ;;  %v1773_v27 = vld [vmem:[%s3266_s0 + $0x48] sm:$0xff]  ;;  %p1221_p8 = scmp.lt.s32.totalorder (%p1942_p3), %s1220_s28, 8 }
  0xa4   : > { %v737_v34 = vadd.f32 %v721_v26, %v683_v38  ;;  %v976_v0 = vmul.f32 %v3451_v30, %v2924_v41  ;;  %v668_v36 = vmul.f32 %v1767_v8, %v2873_v23  ;;  %v278_v19 = vmul.f32 %v1768_v56, %v2789_v6  ;;  %v1769_v23 = vld [vmem:[%s3266_s0 + $0x28] sm:$0xff]  ;;  %v1770_v6 = vld [vmem:[%s3266_s0 + $0x80] sm:$0xff]  ;;  %v1775_v26 = vld [vmem:[%s3266_s0 + $0x58] sm:$0xff] }
  0xa5   : > { %v1125_v7 = vadd.f32 %v1109_v13, %v1058_v15  ;;  %v550_v10 = vadd.f32 %v534_v61, %v483_v55  ;;  %v3029_v30 = vsel %vm243_vm0, %v1009_v49, %v1001_v44  ;;  %v346_v53 = vmul.f32 %v1769_v23, %v2793_v16  ;;  %v1771_v44 = vld [vmem:[%s3266_s0 + $0x38] sm:$0xff]  ;;  %v1774_v13 = vld [vmem:[%s3266_s0 + $0xa0] sm:$0xff]  ;;  %v1781_v56 = vld [vmem:[%s3266_s0 + $0x88] sm:$0xff] }
  0xa6   : > { %v804_v14 = vadd.f32 %v788_v24, %v737_v34  ;;  %v722_v60 = vmul.f32 %v1770_v6, %v2919_v62  ;;  %v294_v48 = vadd.f32 %v278_v19, %v208_v5  ;;  %v414_v49 = vmul.f32 %v1771_v44, %v2803_v21  ;;  %v1782_v23 = vld [vmem:[%s3266_s0 + $0xe0] sm:$0xff]  ;;  %v1783_v6 = vld [vmem:[%s3266_s0 + $0x98] sm:$0xff] }
  0xa7   : > { %v1192_v22 = vadd.f32 %v1176_v17, %v1125_v7  ;;  %v617_v1 = vadd.f32 %v601_v52, %v550_v10  ;;  %v1043_v45 = vmul.f32 %v3455_v63, %v3029_v30  ;;  %v1092_v42 = vsel %vm311_vm1, %v1076_v46, %v1068_v59  ;;  %v1772_v63 = vld [vmem:[%s3266_s0 + $0x90] sm:$0xff] }
  0xa8   : > { %v871_v16 = vadd.f32 %v855_v47, %v804_v14  ;;  %v3064_v37 = vsel %vm379_vm2, %v1143_v51, %v1135_v29  ;;  %v789_v25 = vmul.f32 %v1772_v63, %v1017_v28  ;;  %v362_v40 = vadd.f32 %v346_v53, %v294_v48  ;;  %v1780_v10 = vld [vmem:[%s3266_s0 + $0xd0] sm:$0xff] }
  0xa9   : > { %1208 = vst [vmem:[%s2409_s7 + $0x60] sm:$0xff] %v1192_v22  ;;  %v684_v21 = vadd.f32 %v668_v36, %v617_v1  ;;  %v468_v59 = vmul.f32 %v1773_v27, %v2811_v58  ;;  %v1110_v46 = vmul.f32 %v3456_v50, %v1092_v42  ;;  %v1002_v20 = vrot.slane %v3040_v12, 1 }
  0xaa   : > { %v938_v62 = vadd.f32 %v922_v2, %v871_v16  ;;  %v1010_v29 = vrot.slane %v3043_v54, 1  ;;  %v856_v28 = vmul.f32 %v1774_v13, %v1084_v31  ;;  %v430_v9 = vadd.f32 %v414_v49, %v362_v40  ;;  %v1776_v31 = vld [vmem:[%s3266_s0 + $0xb0] sm:$0xff]  ;;  %v1785_v49 = vld [vmem:[%s3266_s0 + $0xa8] sm:$0xff] }
  0xab   : > { %v738_v51 = vadd.f32 %v722_v60, %v684_v21  ;;  %v535_v58 = vmul.f32 %v1775_v26, %v2891_v39  ;;  %v1177_v50 = vmul.f32 %v3457_v3, %v3064_v37  ;;  %v1069_v33 = vrot.slane %v3040_v12, 2  ;;  %v1777_v39 = vld [vmem:[%s3266_s0 + $0x68] sm:$0xff] }
  0xac   : > { %v992_v32 = vadd.f32 %v976_v0, %v938_v62  ;;  %v1077_v61 = vrot.slane %v3043_v54, 2  ;;  %v923_v17 = vmul.f32 %v1776_v31, %v2991_v11  ;;  %v484_v38 = vadd.f32 %v468_v59, %v430_v9  ;;  %v1778_v11 = vld [vmem:[%s3266_s0 + $0xc0] sm:$0xff]  ;;  %v1787_v59 = vld [vmem:[%s3266_s0 + $0xc8] sm:$0xff]  ;;  %v1790_v9 = vld [vmem:[%s3266_s0 + $0xf8] sm:$0xff] }
  0xad   : > { %v805_v15 = vadd.f32 %v789_v25, %v738_v51  ;;  %v602_v24 = vmul.f32 %v1777_v39, %v2899_v57  ;;  %v1018_v3 = vsel %vm243_vm0, %v1002_v20, %v1010_v29  ;;  %v1136_v43 = vrot.slane %v3040_v12, 3  ;;  %v1779_v57 = vld [vmem:[%s3266_s0 + $0x78] sm:$0xff]  ;;  %v1789_v13 = vld [vmem:[%s3266_s0 + $0xe8] sm:$0xff] }
  0xae   : > { %v1059_v55 = vadd.f32 %v1043_v45, %v992_v32  ;;  %v1144_v52 = vrot.slane %v3043_v54, 3  ;;  %v977_v5 = vmul.f32 %v1778_v11, %v3040_v12  ;;  %v551_v7 = vadd.f32 %v535_v58, %v484_v38 }
  0xaf   : > { %v872_v35 = vadd.f32 %v856_v28, %v805_v15  ;;  %v669_v34 = vmul.f32 %v1779_v57, %v2903_v18  ;;  %v1085_v2 = vsel %vm311_vm1, %v1069_v33, %v1077_v61  ;;  %v1044_v8 = vmul.f32 %v1780_v10, %v1018_v3 }
  0xb0   : > { %v1126_v47 = vadd.f32 %v1110_v46, %v1059_v55  ;;  %v618_v36 = vadd.f32 %v602_v24, %v551_v7  ;;  %v723_v19 = vmul.f32 %v1781_v56, %v2924_v41  ;;  %v1152_v18 = vsel %vm379_vm2, %v1136_v43, %v1144_v52  ;;  %v1784_v41 = vld [vmem:[%s3266_s0 + $0xf0] sm:$0xff] }
  0xb1   : > { %v939_v0 = vadd.f32 %v923_v17, %v872_v35  ;;  %v1111_v53 = vmul.f32 %v1782_v23, %v1085_v2  ;;  %v790_v60 = vmul.f32 %v1783_v6, %v3029_v30  ;;  %v1178_v48 = vmul.f32 %v1784_v41, %v1152_v18  ;;  %v1786_v30 = vld [vmem:[%s3266_s0 + $0xb8] sm:$0xff] }
  0xb2   : > { %v1193_v22 = vadd.f32 %v1177_v50, %v1126_v47  ;;  %v685_v1 = vadd.f32 %v669_v34, %v618_v36  ;;  %v857_v16 = vmul.f32 %v1785_v49, %v1092_v42  ;;  %v924_v63 = vmul.f32 %v1786_v30, %v3064_v37  ;;  %v1788_v37 = vld [vmem:[%s3266_s0 + $0xd8] sm:$0xff] }
  0xb3   : > { %v993_v14 = vadd.f32 %v977_v5, %v939_v0  ;;  %v1026_v25 = vsel %vm243_vm0, %v1010_v29, %v1002_v20  ;;  %v978_v42 = vmul.f32 %v1787_v59, %v3043_v54  ;;  %v1093_v62 = vsel %vm311_vm1, %v1077_v61, %v1069_v33 }
  0xb4   : > { %1209 = vst [vmem:[%s2409_s7 + $0x68] sm:$0x1] %v1193_v22  ;;  %v739_v44 = vadd.f32 %v723_v19, %v685_v1  ;;  %v1045_v51 = vmul.f32 %v1788_v37, %v1026_v25  ;;  %v1160_v20 = vsel %vm379_vm2, %v1144_v52, %v1136_v43  ;;  %v1112_v28 = vmul.f32 %v1789_v13, %v1093_v62 }
  0xb5   : > { %v1060_v12 = vadd.f32 %v1044_v8, %v993_v14  ;;  %v1179_v26 = vmul.f32 %v1790_v9, %v1160_v20 }
  0xb6   : > { %v806_v21 = vadd.f32 %v790_v60, %v739_v44 }
  0xb7   : > { %v1127_v45 = vadd.f32 %v1111_v53, %v1060_v12 }
  0xb8   : > { %v873_v27 = vadd.f32 %v857_v16, %v806_v21 }
  0xb9   : > { %v1194_v40 = vadd.f32 %v1178_v48, %v1127_v45 }
  0xba   : > { %v940_v46 = vadd.f32 %v924_v63, %v873_v27 }
  0xbb   : > { %1210 = vst [vmem:[%s2409_s7 + $0x70] sm:$0xff] %v1194_v40 }
  0xbc   : > { %v994_v29 = vadd.f32 %v978_v42, %v940_v46 }
  0xbe   : > { %v1061_v54 = vadd.f32 %v1045_v51, %v994_v29  ;;  %1218 = sbr.rel (!%p1942_p3) target bundleno = 246 (0xf6), region = 32 }
  0xc0   : > { %v1128_v58 = vadd.f32 %v1112_v28, %v1061_v54 }
  0xc2   : > { %v1195_v32 = vadd.f32 %v1179_v26, %v1128_v58 }
  0xc4   : > { %1211 = vst [vmem:[%s2409_s7 + $0x78] sm:$0x1] %v1195_v32 }
  0xc5   : > { %s3474_s28 = smov (!%p1221_p8, %s1220_s28), 8 }
  0xc6   : > { %s1650_s29 = sshll.u32 %s3474_s28, 8  ;;  %s1633_s30 = sshll.u32 %s3474_s28, 1 }
  0xc7   : > { %p1634_p9 = scmp.eq.s32.totalorder %s1650_s29, 0 }
  0xc8   : > { %s3173_s17 = sshrl.u32 (!%p1634_p9), %s1633_s30, 4 }
  0xc9   : > { %1233 = sbr.rel (%p1634_p9) target bundleno = 246 (0xf6), region = 36  ;;  %p1635_p10 = scmp.le.s32.totalorder (!%p1634_p9), %s3173_s17, 0 }
  0xd0   : > { %1469 = sbr.rel (%p1635_p10) target bundleno = 225 (0xe1), region = 134  ;;  %s3464_s11 = smov (!%p1635_p10), %s3165_s27 }
  0xd1   : > { %s3465_s20 = smov (!%p1635_p10), %s2409_s7  ;;  %s3182_s3 = smov (!%p1635_p10), 0  }
  0xd2   : > { %s3184_s4 = smov (!%p1635_p10), 0  }
  0xd7 LB: >> { %v1325_v4 = vld [vmem:[%s1869_s20] sm:$0xff]  ;;  %v1327_v50 = vld [vmem:[%s1869_s20 + $0x8] sm:$0xff]  ;;  %v1329_v33 = vld [vmem:[%s1869_s20 + $0x10] sm:$0xff]  ;;  %s1357_s5 = sadd.s32 1, %s1873_s3  ;;  %s1319_s4 = sadd.s32 1, %s1877_s4   ;;  %s1877_s4 = sphi %s3184_s4, %s1319_s4   ;;  %s1873_s3 = sphi %s3182_s3, %s3466_s3   ;;  %s1869_s20 = sphi %s3465_s20, %s1362_s20   ;;  %s1865_s11 = sphi %s3464_s11, %s1363_s11  }
  0xd8   : >> { %1326 = vst [vmem:[%s1865_s11] sm:$0xff] %v1325_v4  ;;  %1328 = vst [vmem:[%s1865_s11 + $0x8] sm:$0xff] %v1327_v50  ;;  %v1331_v61 = vld [vmem:[%s1869_s20 + $0x18] sm:$0xff]  ;;  %v1333_v15 = vld [vmem:[%s1869_s20 + $0x20] sm:$0xff]  ;;  %p1358_p11 = scmp.ge.s32.totalorder %s1357_s5, %s3173_s17  ;;  %p1318_p12 = scmp.ge.s32.totalorder %s1319_s4, %s3173_s17 }
  0xd9   : >> { %1330 = vst [vmem:[%s1865_s11 + $0x10] sm:$0xff] %v1329_v33  ;;  %v1335_v31 = vld [vmem:[%s1869_s20 + $0x28] sm:$0xff]  ;;  %1332 = vst [vmem:[%s1865_s11 + $0x18] sm:$0xff] %v1331_v61  ;;  %v1337_v17 = vld [vmem:[%s1869_s20 + $0x30] sm:$0xff] }
  0xda   : >> { %1334 = vst [vmem:[%s1865_s11 + $0x20] sm:$0xff] %v1333_v15  ;;  %1336 = vst [vmem:[%s1865_s11 + $0x28] sm:$0xff] %v1335_v31  ;;  %v1339_v38 = vld [vmem:[%s1869_s20 + $0x38] sm:$0xff]  ;;  %v1341_v39 = vld [vmem:[%s1869_s20 + $0x40] sm:$0xff]  ;;  %s3476_s5 = smov (%p1358_p11, %s1357_s5), 0  ;;  %1321 = sbr.rel (!%p1318_p12) target bundleno = 215 (0xd7), region = 140 }
  0xdb   : >> { %1338 = vst [vmem:[%s1865_s11 + $0x30] sm:$0xff] %v1337_v17  ;;  %1340 = vst [vmem:[%s1865_s11 + $0x38] sm:$0xff] %v1339_v38  ;;  %v1343_v24 = vld [vmem:[%s1869_s20 + $0x48] sm:$0xff]  ;;  %v1345_v55 = vld [vmem:[%s1869_s20 + $0x50] sm:$0xff]  ;;  %s1636_s6 = sshll.u32 %s3476_s5, 7  ;;  %s3466_s3 = smov %s3476_s5 }
  0xdc   : >> { %1342 = vst [vmem:[%s1865_s11 + $0x40] sm:$0xff] %v1341_v39  ;;  %v1347_v3 = vld [vmem:[%s1869_s20 + $0x58] sm:$0xff]  ;;  %1344 = vst [vmem:[%s1865_s11 + $0x48] sm:$0xff] %v1343_v24  ;;  %v1349_v43 = vld [vmem:[%s1869_s20 + $0x60] sm:$0xff] }
  0xdd   : >> { %1346 = vst [vmem:[%s1865_s11 + $0x50] sm:$0xff] %v1345_v55  ;;  %1348 = vst [vmem:[%s1865_s11 + $0x58] sm:$0xff] %v1347_v3  ;;  %v1351_v52 = vld [vmem:[%s1869_s20 + $0x68] sm:$0xff]  ;;  %v1353_v35 = vld [vmem:[%s1869_s20 + $0x70] sm:$0xff] }
  0xde   : >> { %1350 = vst [vmem:[%s1865_s11 + $0x60] sm:$0xff] %v1349_v43  ;;  %1352 = vst [vmem:[%s1865_s11 + $0x68] sm:$0xff] %v1351_v52  ;;  %v1355_v11 = vld [vmem:[%s1869_s20 + $0x78] sm:$0xff]  ;;  %s1362_s20 = scalar_lea.vmem %s2409_s7, %s1636_s6 [#allocation2]  }
  0xdf   : >> { %1354 = vst [vmem:[%s1865_s11 + $0x70] sm:$0xff] %v1353_v35  ;;  %1356 = vst [vmem:[%s1865_s11 + $0x78] sm:$0xff] %v1355_v11  ;;  %s1363_s11 = scalar_lea.vmem %s3165_s27, %s1636_s6  }
  0xe1 PF: > { %s3243_s8 = sand.u32 15, %s1633_s30   ;;  %s1653_s14 = sshll.u32 %s3173_s17, 7 }
  0xe2   : > { %s1368_s16 = scalar_lea.vmem %s2409_s7, %s1653_s14 [#allocation2]   ;;  %s1370_s18 = scalar_lea.vmem %s3165_s27, %s1653_s14  }
  0xe3   : > { %p1641_p13 = scmp.le.s32.totalorder %s3243_s8, 0 }
  0xe4   : > { %s1879_s21 = smov (!%p1641_p13), %s1370_s18   ;;  %s1883_s22 = smov (!%p1641_p13), %s1368_s16  }
  0xe5   : > { %1483 = sbr.rel (%p1641_p13) target bundleno = 246 (0xf6), region = 145  ;;  %s1887_s23 = smov (!%p1641_p13), 0  }
  0xe6   : > { %s1891_s24 = smov (!%p1641_p13), 0  }
  0xec LB: >> { %v1380_v5 = vld [vmem:[%s1885_s22] sm:$0xff]  ;;  %s1382_s25 = sadd.s32 1, %s1889_s23  ;;  %s1374_s24 = sadd.s32 1, %s1893_s24   ;;  %s1893_s24 = sphi %s1891_s24, %s1374_s24   ;;  %s1889_s23 = sphi %s1887_s23, %s1888_s23   ;;  %s1885_s22 = sphi %s1883_s22, %s1387_s22   ;;  %s1881_s21 = sphi %s1879_s21, %s1388_s21  }
  0xed   : >> { %1381 = vst [vmem:[%s1881_s21] sm:$0xff] %v1380_v5  ;;  %p1383_p0 = scmp.ge.s32.totalorder %s1382_s25, %s3243_s8  ;;  %p1373_p1 = scmp.ge.s32.totalorder %s1374_s24, %s3243_s8 }
  0xef   : >> { %s3478_s25 = smov (%p1383_p0, %s1382_s25), 0  ;;  %1376 = sbr.rel (!%p1373_p1) target bundleno = 236 (0xec), region = 151 }
  0xf0   : >> { %s1642_s7 = sshll.u32 %s3478_s25, 3  ;;  %s1888_s23 = smov %s3478_s25  }
  0xf1   : >> { %s1387_s22 = scalar_lea.vmem %s1368_s16, %s1642_s7 [#allocation2]   ;;  %s1388_s21 = scalar_lea.vmem %s1370_s18, %s1642_s7  }
  0xf6 PF: > { %s12_s13 = sadd.s32 1, %s1861_s13   ;;  %s3467_s9 = smov %s1849_s10 }
  0xf7   : > { %p9_p2 = scmp.ge.s32.totalorder %s12_s13, 4   ;;  %s3468_s10 = smov %s1951_s19 }
  0xf8   : > { %s3469_s11 = smov %s1857_s12  ;;  %s3470_s12 = smov %s3472_s15 }
  0xf9   :  { %11 = sbr.rel (!%p9_p2) target bundleno = 3 (0x3), region = 162 }

</bundles_post_ra>
